<compile_context>
chip_gen: v5e
topology: v5e:2x2
jax: 0.10.0
libtpu: 0.0.40
codegen_flags: <defaults>
</compile_context>

<pallas_src>
import jax
import jax.numpy as jnp
from jax.experimental import pallas as pl
from jax.experimental.pallas import tpu as pltpu


def _layernorm(x, w, b):
    mu = jnp.mean(x, axis=-1, keepdims=True)
    var = jnp.mean((x - mu) ** 2, axis=-1, keepdims=True)
    return (x - mu) * jax.lax.rsqrt(var + 1e-5) * w + b


# ----------------------------------------------------------------------------
# Fused forward kernel: (precomputed embeddings) -> L transformer blocks ->
# decoder projection (padded vocab) -> mean cross-entropy. Single invocation,
# everything resident in VMEM, batch folded into matmul rows.
# ----------------------------------------------------------------------------
def make_fused_kernel(num_blocks, num_heads, B, T):
    def kernel(x_ref, tgt_ref,
               in_w, in_b, op_w, op_b,
               ff1_w, ff1_b, ff2_w, ff2_b,
               ln1_w, ln1_b, ln2_w, ln2_b, ln3_w, ln3_b,
               dec_w, dec_b,
               logits_ref, loss_ref):
        BT, C = x_ref.shape                       # (B*T, C)
        D = C // num_heads
        H = num_heads

        # Causal keep-mask, built ONCE and reused across all layers.
        row = jax.lax.broadcasted_iota(jnp.int32, (1, T, T), 1)
        col = jax.lax.broadcasted_iota(jnp.int32, (1, T, T), 2)
        keep = col <= row                          # (1, T, T) bool

        x2 = x_ref[...]                            # (BT, C)

        for l in range(num_blocks):                # static unroll (small L)
            # ---- prenorm + fused qkv projection (scale pre-folded into Q) ----
            xn2 = _layernorm(x2, ln1_w[l], ln1_b[l])
            qkv = jnp.dot(xn2, in_w[l],
                          preferred_element_type=jnp.float32) + in_b[l]   # (BT, 3C)
            qkv3 = qkv.reshape(B, T, 3 * C)

            # ---- fold heads into the einsum batch axis: (H*B, T, D) ----
            q = jnp.concatenate(
                [qkv3[:, :, h * D:(h + 1) * D] for h in range(H)], axis=0)
            k = jnp.concatenate(
                [qkv3[:, :, C + h * D:C + (h + 1) * D] for h in range(H)], axis=0)
            v = jnp.concatenate(
                [qkv3[:, :, 2 * C + h * D:2 * C + (h + 1) * D] for h in range(H)],
                axis=0)

            # ---- causal attention, batched over (H*B) in ONE pair of einsums ----
            s = jnp.einsum('bid,bjd->bij', q, k,
                           preferred_element_type=jnp.float32)            # (HB,T,T)
            s = jnp.where(keep, s, -1e30)          # mask BEFORE the max (no NaN path)
            m = jnp.max(s, axis=-1, keepdims=True)
            e = jnp.exp(s - m)                     # masked entries underflow to 0
            a = e * pl.reciprocal(jnp.sum(e, axis=-1, keepdims=True), approx=True)
            o = jnp.einsum('bij,bjd->bid', a, v,
                           preferred_element_type=jnp.float32)            # (HB,T,D)

            # reassemble heads -> (BT, C)
            attn2 = jnp.concatenate(
                [o[h * B:(h + 1) * B] for h in range(H)], axis=-1).reshape(BT, C)

            # fused (MHA out-proj @ Block projection) + residual onto xn2
            att_res = xn2 + jnp.dot(attn2, op_w[l],
                                    preferred_element_type=jnp.float32) + op_b[l]
            an = _layernorm(att_res, ln2_w[l], ln2_b[l])

            # FeedForward: ReLU(an @ W1 + b1) @ W2 + b2  (dropout = identity)
            hdn = jnp.maximum(
                jnp.dot(an, ff1_w[l], preferred_element_type=jnp.float32) + ff1_b[l],
                0.0)
            ff = jnp.dot(hdn, ff2_w[l],
                         preferred_element_type=jnp.float32) + ff2_b[l]

            x2 = _layernorm(an + ff, ln3_w[l], ln3_b[l])

        # ---- decoder projection (vocab padded to lane-dense Vp) ----
        logits = jnp.dot(x2, dec_w[...],
                         preferred_element_type=jnp.float32) + dec_b[...]  # (BT, Vp)
        logits_ref[...] = logits

        # ---- mean cross-entropy (pad columns carry -1e9 bias -> excluded) ----
        m2 = jnp.max(logits, axis=-1, keepdims=True)
        z = logits - m2
        lse = jnp.log(jnp.sum(jnp.exp(z), axis=-1, keepdims=True))
        vcol = jax.lax.broadcasted_iota(jnp.int32, logits.shape, 1)
        z_tgt = jnp.sum(jnp.where(vcol == tgt_ref[...], z, 0.0),
                        axis=-1, keepdims=True)
        per_row = lse - z_tgt                                              # (BT, 1)
        loss_ref[...] = jnp.sum(per_row, axis=0, keepdims=True) * (1.0 / BT)

    return kernel


# ----------------------------------------------------------------------------
# Host-side packing:
#  * stack per-block weights along a leading block axis,
#  * pre-transpose every linear weight to (in, out),
#  * fold 1/sqrt(D) into the Q rows of in_proj (weight + bias),
#  * fuse MHA out-proj with Block.projection into one (C,C) matmul,
#  * pad the decoder vocab dim to a multiple of 128 lanes (-1e9 pad bias).
# ----------------------------------------------------------------------------
def pack_params(params, num_heads):
    blocks = params["blocks"]
    C = params["tok_emb"].shape[1]
    D = C // num_heads
    scale = 1.0 / (D ** 0.5)

    def stack(fn):
        return jnp.stack([fn(b) for b in blocks], axis=0)

    def in_w_t(b):
        w = b["in_w"].at[:C].multiply(scale)       # scale Q rows (torch (3C,C) layout)
        return w.T                                 # -> (C, 3C)

    def in_b_s(b):
        return b["in_b"].at[:, :C].multiply(scale)

    def fused_op_w(b):                             # attn @ (out_w.T @ proj_w.T)
        return b["out_w"].T @ b["proj_w"].T        # (C, C)

    def fused_op_b(b):
        return b["out_b"] @ b["proj_w"].T + b["proj_b"]   # (1, C)

    packed = [
        stack(in_w_t), stack(in_b_s),
        stack(fused_op_w), stack(fused_op_b),
        stack(lambda b: b["ff1_w"].T), stack(lambda b: b["ff1_b"]),
        stack(lambda b: b["ff2_w"].T), stack(lambda b: b["ff2_b"]),
        stack(lambda b: b["ln1_w"]), stack(lambda b: b["ln1_b"]),
        stack(lambda b: b["ln2_w"]), stack(lambda b: b["ln2_b"]),
        stack(lambda b: b["ln3_w"]), stack(lambda b: b["ln3_b"]),
    ]

    V = params["dec_w"].shape[0]
    Vp = ((V + 127) // 128) * 128
    dec_w = jnp.zeros((C, Vp), jnp.float32).at[:, :V].set(params["dec_w"].T)
    dec_b = jnp.full((1, Vp), -1e9, jnp.float32).at[:, :V].set(params["dec_b"])
    packed += [dec_w, dec_b]
    return packed, Vp


def model_forward(params, tokens, targets, num_heads):
    B, T = tokens.shape
    C = params["tok_emb"].shape[1]
    V = params["dec_w"].shape[0]
    L = len(params["blocks"])

    # embedding gather + position add: cheap XLA glue outside the kernel
    x = jnp.take(params["tok_emb"], tokens, axis=0) + params["pos_emb"][:T][None, :, :]
    x2 = x.reshape(B * T, C).astype(jnp.float32)
    tgt = targets.reshape(B * T, 1).astype(jnp.int32)

    packed, Vp = pack_params(params, num_heads)

    logits_p, loss11 = pl.pallas_call(
        make_fused_kernel(L, num_heads, B, T),
        out_shape=(jax.ShapeDtypeStruct((B * T, Vp), jnp.float32),
                   jax.ShapeDtypeStruct((1, 1), jnp.float32)),
        compiler_params=pltpu.CompilerParams(vmem_limit_bytes=32 * 1024 * 1024),
    )(x2, tgt, *packed)
    # module semantics: logits of shape (B*T, V) and scalar mean loss
    return logits_p[:, :V], loss11[0, 0]


# ----------------------------------------------------------------------------
# Pure-JAX reference (same math, unfused) for correctness check.
# ----------------------------------------------------------------------------
def _ref_ln(x, w, b):
    mu = jnp.mean(x, axis=-1, keepdims=True)
    var = jnp.mean((x - mu) ** 2, axis=-1, keepdims=True)
    return (x - mu) * jax.lax.rsqrt(var + 1e-5) * w + b


def _ref_block(x, p, num_heads):                   # x: (B, T, C)
    B, T, C = x.shape
    D = C // num_heads
    xn = _ref_ln(x, p["ln1_w"], p["ln1_b"])
    qkv = xn @ p["in_w"].T + p["in_b"]
    q, k, v = qkv[..., :C], qkv[..., C:2 * C], qkv[..., 2 * C:]
    mask = jnp.triu(jnp.full((T, T), -jnp.inf), k=1)
    heads = []
    for h in range(num_heads):
        qh, kh, vh = (t[..., h * D:(h + 1) * D] for t in (q, k, v))
        s = jnp.einsum('bid,bjd->bij', qh, kh) / (D ** 0.5) + mask
        a = jax.nn.softmax(s, axis=-1)
        heads.append(jnp.einsum('bij,bjd->bid', a, vh))
    attn = jnp.concatenate(heads, axis=-1) @ p["out_w"].T + p["out_b"]
    att_res = xn + attn @ p["proj_w"].T + p["proj_b"]
    an = _ref_ln(att_res, p["ln2_w"], p["ln2_b"])
    ff = jnp.maximum(an @ p["ff1_w"].T + p["ff1_b"], 0.0) @ p["ff2_w"].T + p["ff2_b"]
    return _ref_ln(an + ff, p["ln3_w"], p["ln3_b"])


def reference_forward(params, tokens, targets, num_heads):
    B, T = tokens.shape
    x = jnp.take(params["tok_emb"], tokens, axis=0) + params["pos_emb"][:T][None, :, :]
    for blk in params["blocks"]:
        x = _ref_block(x, blk, num_heads)
    logits = x @ params["dec_w"].T + params["dec_b"]
    V = logits.shape[-1]
    l2 = logits.reshape(B * T, V)
    logp = jax.nn.log_softmax(l2, axis=-1)
    loss = -jnp.mean(logp[jnp.arange(B * T), targets.reshape(B * T)])
    return l2, loss


# ----------------------------------------------------------------------------
# Deterministic parameter init (synthetic; not a checkpoint). PyTorch layouts.
# ----------------------------------------------------------------------------
def init_params(key, size_context, num_embeddings, size_embedding, num_blocks):
    C, V, T = size_embedding, num_embeddings, size_context
    ks = iter(jax.random.split(key, 8 + 12 * num_blocks))

    def nrm(shape, scale=0.02):
        return scale * jax.random.normal(next(ks), shape, dtype=jnp.float32)

    params = {
        "tok_emb": nrm((V, C), 1.0),
        "pos_emb": nrm((T, C), 1.0),
        "dec_w": nrm((V, C)),
        "dec_b": nrm((1, V)),
        "blocks": [],
    }
    for _ in range(num_blocks):
        params["blocks"].append({
            "in_w": nrm((3 * C, C)),  "in_b": nrm((1, 3 * C)),
            "out_w": nrm((C, C)),     "out_b": nrm((1, C)),
            "proj_w": nrm((C, C)),    "proj_b": nrm((1, C)),
            "ff1_w": nrm((4 * C, C)), "ff1_b": nrm((1, 4 * C)),
            "ff2_w": nrm((C, 4 * C)), "ff2_b": nrm((1, C)),
            "ln1_w": jnp.ones((1, C), jnp.float32), "ln1_b": jnp.zeros((1, C), jnp.float32),
            "ln2_w": jnp.ones((1, C), jnp.float32), "ln2_b": jnp.zeros((1, C), jnp.float32),
            "ln3_w": jnp.ones((1, C), jnp.float32), "ln3_b": jnp.zeros((1, C), jnp.float32),
        })
    return params


if __name__ == "__main__":
    size_context = 8
    num_embeddings = 64
    size_embedding = 32
    num_heads = 4
    num_blocks = 2
    B = 2

    key = jax.random.PRNGKey(0)
    kp, kx, kt = jax.random.split(key, 3)
    params = init_params(kp, size_context, num_embeddings, size_embedding, num_blocks)

    tokens = jax.random.randint(kx, (B, size_context), 0, num_embeddings, dtype=jnp.int32)
    targets = jax.random.randint(kt, (B, size_context), 0, num_embeddings, dtype=jnp.int32)

    logits, loss = model_forward(params, tokens, targets, num_heads)
    jax.block_until_ready((logits, loss))

    ref_logits, ref_loss = reference_forward(params, tokens, targets, num_heads)
    # approx-reciprocal softmax + host-side weight fusion -> slightly looser tol
    assert jnp.allclose(logits, ref_logits, atol=5e-3, rtol=5e-3), "logits mismatch"
    assert jnp.allclose(loss, ref_loss, atol=5e-3, rtol=5e-3), "loss mismatch"

    print("KERNEL_OK")
</pallas_src>

<mosaic_0001>
module attributes {stable_mosaic.version = 11 : i64} {
  func.func @kernel(%arg0: memref<16x32xf32, #tpu.memory_space<vmem>>, %arg1: memref<16x1xi32, #tpu.memory_space<vmem>>, %arg2: memref<2x32x96xf32, #tpu.memory_space<vmem>>, %arg3: memref<2x1x96xf32, #tpu.memory_space<vmem>>, %arg4: memref<2x32x32xf32, #tpu.memory_space<vmem>>, %arg5: memref<2x1x32xf32, #tpu.memory_space<vmem>>, %arg6: memref<2x32x128xf32, #tpu.memory_space<vmem>>, %arg7: memref<2x1x128xf32, #tpu.memory_space<vmem>>, %arg8: memref<2x128x32xf32, #tpu.memory_space<vmem>>, %arg9: memref<2x1x32xf32, #tpu.memory_space<vmem>>, %arg10: memref<2x1x32xf32, #tpu.memory_space<vmem>>, %arg11: memref<2x1x32xf32, #tpu.memory_space<vmem>>, %arg12: memref<2x1x32xf32, #tpu.memory_space<vmem>>, %arg13: memref<2x1x32xf32, #tpu.memory_space<vmem>>, %arg14: memref<2x1x32xf32, #tpu.memory_space<vmem>>, %arg15: memref<2x1x32xf32, #tpu.memory_space<vmem>>, %arg16: memref<32x128xf32, #tpu.memory_space<vmem>>, %arg17: memref<1x128xf32, #tpu.memory_space<vmem>>, %arg18: memref<16x128xf32, #tpu.memory_space<vmem>>, %arg19: memref<1x1xf32, #tpu.memory_space<vmem>>) attributes {dimension_semantics = [], scalar_prefetch = 0 : i64, scratch_operands = 0 : i64, tpu.core_type = #tpu.core_type<tc>} {
    %0 = tpu.iota {dimensions = array<i32: 1>} : vector<1x8x8xi32>
    %1 = tpu.iota {dimensions = array<i32: 2>} : vector<1x8x8xi32>
    %2 = arith.cmpi sle, %1, %0 : vector<1x8x8xi32>
    %c0 = arith.constant 0 : index
    %c0_0 = arith.constant 0 : index
    %3 = vector.load %arg0[%c0, %c0_0] : memref<16x32xf32, #tpu.memory_space<vmem>>, vector<16x32xf32>
    %c0_1 = arith.constant 0 : index
    %c0_2 = arith.constant 0 : index
    %c0_3 = arith.constant 0 : index
    %4 = vector.load %arg10[%c0_1, %c0_2, %c0_3] : memref<2x1x32xf32, #tpu.memory_space<vmem>>, vector<1x1x32xf32>
    %5 = vector.shape_cast %4 : vector<1x1x32xf32> to vector<1x32xf32>
    %c0_4 = arith.constant 0 : index
    %c0_5 = arith.constant 0 : index
    %c0_6 = arith.constant 0 : index
    %6 = vector.load %arg11[%c0_4, %c0_5, %c0_6] : memref<2x1x32xf32, #tpu.memory_space<vmem>>, vector<1x1x32xf32>
    %7 = vector.shape_cast %6 : vector<1x1x32xf32> to vector<1x32xf32>
    %cst = arith.constant dense<0.000000e+00> : vector<16xf32>
    %8 = vector.multi_reduction <add>, %3, %cst [1] : vector<16x32xf32> to vector<16xf32>
    %9 = vector.shape_cast %8 : vector<16xf32> to vector<16x1xf32>
    %cst_7 = arith.constant 3.200000e+01 : f32
    %10 = vector.broadcast %cst_7 : f32 to vector<16x1xf32>
    %11 = arith.divf %9, %10 : vector<16x1xf32>
    %12 = vector.broadcast %11 : vector<16x1xf32> to vector<16x32xf32>
    %13 = arith.subf %3, %12 : vector<16x32xf32>
    %14 = arith.mulf %13, %13 : vector<16x32xf32>
    %cst_8 = arith.constant dense<0.000000e+00> : vector<16xf32>
    %15 = vector.multi_reduction <add>, %14, %cst_8 [1] : vector<16x32xf32> to vector<16xf32>
    %16 = vector.shape_cast %15 : vector<16xf32> to vector<16x1xf32>
    %cst_9 = arith.constant 3.200000e+01 : f32
    %17 = vector.broadcast %cst_9 : f32 to vector<16x1xf32>
    %18 = arith.divf %16, %17 : vector<16x1xf32>
    %19 = vector.broadcast %11 : vector<16x1xf32> to vector<16x32xf32>
    %20 = arith.subf %3, %19 : vector<16x32xf32>
    %cst_10 = arith.constant 9.99999974E-6 : f32
    %21 = vector.broadcast %cst_10 : f32 to vector<16x1xf32>
    %22 = arith.addf %18, %21 : vector<16x1xf32>
    %23 = math.rsqrt %22 : vector<16x1xf32>
    %24 = vector.broadcast %23 : vector<16x1xf32> to vector<16x32xf32>
    %25 = arith.mulf %20, %24 : vector<16x32xf32>
    %26 = vector.broadcast %5 : vector<1x32xf32> to vector<16x32xf32>
    %27 = arith.mulf %25, %26 : vector<16x32xf32>
    %28 = vector.broadcast %7 : vector<1x32xf32> to vector<16x32xf32>
    %29 = arith.addf %27, %28 : vector<16x32xf32>
    %c0_11 = arith.constant 0 : index
    %c0_12 = arith.constant 0 : index
    %c0_13 = arith.constant 0 : index
    %30 = vector.load %arg2[%c0_11, %c0_12, %c0_13] : memref<2x32x96xf32, #tpu.memory_space<vmem>>, vector<1x32x96xf32>
    %31 = vector.shape_cast %30 : vector<1x32x96xf32> to vector<32x96xf32>
    %cst_14 = arith.constant dense<0.000000e+00> : vector<16x96xf32>
    %32 = tpu.matmul %29, %31, %cst_14 {dimension_numbers = #tpu.dot_dimension_numbers<[1], [0], [0], [1], [0, 0, 1, 1], [], []>} : vector<16x32xf32>, vector<32x96xf32>, vector<16x96xf32> -> vector<16x96xf32>
    %c0_15 = arith.constant 0 : index
    %c0_16 = arith.constant 0 : index
    %c0_17 = arith.constant 0 : index
    %33 = vector.load %arg3[%c0_15, %c0_16, %c0_17] : memref<2x1x96xf32, #tpu.memory_space<vmem>>, vector<1x1x96xf32>
    %34 = vector.shape_cast %33 : vector<1x1x96xf32> to vector<1x96xf32>
    %35 = vector.broadcast %34 : vector<1x96xf32> to vector<16x96xf32>
    %36 = arith.addf %32, %35 : vector<16x96xf32>
    %37 = vector.shape_cast %36 : vector<16x96xf32> to vector<2x8x96xf32>
    %38 = vector.extract_strided_slice %37 {offsets = [0, 0, 0], sizes = [2, 8, 8], strides = [1, 1, 1]} : vector<2x8x96xf32> to vector<2x8x8xf32>
    %39 = vector.extract_strided_slice %37 {offsets = [0, 0, 8], sizes = [2, 8, 8], strides = [1, 1, 1]} : vector<2x8x96xf32> to vector<2x8x8xf32>
    %40 = vector.extract_strided_slice %37 {offsets = [0, 0, 16], sizes = [2, 8, 8], strides = [1, 1, 1]} : vector<2x8x96xf32> to vector<2x8x8xf32>
    %41 = vector.extract_strided_slice %37 {offsets = [0, 0, 24], sizes = [2, 8, 8], strides = [1, 1, 1]} : vector<2x8x96xf32> to vector<2x8x8xf32>
    %42 = tpu.concatenate %38, %39, %40, %41 in 0 : vector<2x8x8xf32>, vector<2x8x8xf32>, vector<2x8x8xf32>, vector<2x8x8xf32> -> vector<8x8x8xf32>
    %43 = vector.extract_strided_slice %37 {offsets = [0, 0, 32], sizes = [2, 8, 8], strides = [1, 1, 1]} : vector<2x8x96xf32> to vector<2x8x8xf32>
    %44 = vector.extract_strided_slice %37 {offsets = [0, 0, 40], sizes = [2, 8, 8], strides = [1, 1, 1]} : vector<2x8x96xf32> to vector<2x8x8xf32>
    %45 = vector.extract_strided_slice %37 {offsets = [0, 0, 48], sizes = [2, 8, 8], strides = [1, 1, 1]} : vector<2x8x96xf32> to vector<2x8x8xf32>
    %46 = vector.extract_strided_slice %37 {offsets = [0, 0, 56], sizes = [2, 8, 8], strides = [1, 1, 1]} : vector<2x8x96xf32> to vector<2x8x8xf32>
    %47 = tpu.concatenate %43, %44, %45, %46 in 0 : vector<2x8x8xf32>, vector<2x8x8xf32>, vector<2x8x8xf32>, vector<2x8x8xf32> -> vector<8x8x8xf32>
    %48 = vector.extract_strided_slice %37 {offsets = [0, 0, 64], sizes = [2, 8, 8], strides = [1, 1, 1]} : vector<2x8x96xf32> to vector<2x8x8xf32>
    %49 = vector.extract_strided_slice %37 {offsets = [0, 0, 72], sizes = [2, 8, 8], strides = [1, 1, 1]} : vector<2x8x96xf32> to vector<2x8x8xf32>
    %50 = vector.extract_strided_slice %37 {offsets = [0, 0, 80], sizes = [2, 8, 8], strides = [1, 1, 1]} : vector<2x8x96xf32> to vector<2x8x8xf32>
    %51 = vector.extract_strided_slice %37 {offsets = [0, 0, 88], sizes = [2, 8, 8], strides = [1, 1, 1]} : vector<2x8x96xf32> to vector<2x8x8xf32>
    %52 = tpu.concatenate %48, %49, %50, %51 in 0 : vector<2x8x8xf32>, vector<2x8x8xf32>, vector<2x8x8xf32>, vector<2x8x8xf32> -> vector<8x8x8xf32>
    "tpu.trace_start"() <{level = 10 : i32, message = "bid,bjd->bij"}> : () -> ()
    %cst_18 = arith.constant dense<0.000000e+00> : vector<8x8x8xf32>
    %53 = tpu.matmul %42, %47, %cst_18 {dimension_numbers = #tpu.dot_dimension_numbers<[2], [2], [1], [1], [0, 0, 0, 1, 1, 1], [0], [0]>} : vector<8x8x8xf32>, vector<8x8x8xf32>, vector<8x8x8xf32> -> vector<8x8x8xf32>
    %cst_19 = arith.constant -1.000000e+30 : f32
    "tpu.trace_stop"() : () -> ()
    %54 = vector.shape_cast %2 : vector<1x8x8xi1> to vector<1x8x8xi1>
    %55 = vector.broadcast %54 : vector<1x8x8xi1> to vector<8x8x8xi1>
    %56 = vector.broadcast %cst_19 : f32 to vector<8x8x8xf32>
    %57 = arith.select %55, %53, %56 : vector<8x8x8xi1>, vector<8x8x8xf32>
    %cst_20 = arith.constant dense<0xFF800000> : vector<8x8xf32>
    %58 = vector.multi_reduction <maximumf>, %57, %cst_20 [2] : vector<8x8x8xf32> to vector<8x8xf32>
    %59 = vector.shape_cast %58 : vector<8x8xf32> to vector<8x8x1xf32>
    %60 = vector.broadcast %59 : vector<8x8x1xf32> to vector<8x8x8xf32>
    %61 = arith.subf %57, %60 : vector<8x8x8xf32>
    %62 = math.exp %61 : vector<8x8x8xf32>
    %cst_21 = arith.constant dense<0.000000e+00> : vector<8x8xf32>
    %63 = vector.multi_reduction <add>, %62, %cst_21 [2] : vector<8x8x8xf32> to vector<8x8xf32>
    %64 = vector.shape_cast %63 : vector<8x8xf32> to vector<8x8x1xf32>
    %65 = tpu.reciprocal %64 {approx = true} : vector<8x8x1xf32> -> vector<8x8x1xf32>
    %66 = vector.broadcast %65 : vector<8x8x1xf32> to vector<8x8x8xf32>
    %67 = arith.mulf %62, %66 : vector<8x8x8xf32>
    "tpu.trace_start"() <{level = 10 : i32, message = "bij,bjd->bid"}> : () -> ()
    %cst_22 = arith.constant dense<0.000000e+00> : vector<8x8x8xf32>
    %68 = tpu.matmul %67, %52, %cst_22 {dimension_numbers = #tpu.dot_dimension_numbers<[2], [1], [1], [2], [0, 0, 0, 1, 1, 2], [0], [0]>} : vector<8x8x8xf32>, vector<8x8x8xf32>, vector<8x8x8xf32> -> vector<8x8x8xf32>
    "tpu.trace_stop"() : () -> ()
    %69 = vector.extract_strided_slice %68 {offsets = [0, 0, 0], sizes = [2, 8, 8], strides = [1, 1, 1]} : vector<8x8x8xf32> to vector<2x8x8xf32>
    %70 = vector.extract_strided_slice %68 {offsets = [2, 0, 0], sizes = [2, 8, 8], strides = [1, 1, 1]} : vector<8x8x8xf32> to vector<2x8x8xf32>
    %71 = vector.extract_strided_slice %68 {offsets = [4, 0, 0], sizes = [2, 8, 8], strides = [1, 1, 1]} : vector<8x8x8xf32> to vector<2x8x8xf32>
    %72 = vector.extract_strided_slice %68 {offsets = [6, 0, 0], sizes = [2, 8, 8], strides = [1, 1, 1]} : vector<8x8x8xf32> to vector<2x8x8xf32>
    %73 = tpu.concatenate %69, %70, %71, %72 in 2 : vector<2x8x8xf32>, vector<2x8x8xf32>, vector<2x8x8xf32>, vector<2x8x8xf32> -> vector<2x8x32xf32>
    %74 = vector.shape_cast %73 : vector<2x8x32xf32> to vector<16x32xf32>
    %c0_23 = arith.constant 0 : index
    %c0_24 = arith.constant 0 : index
    %c0_25 = arith.constant 0 : index
    %75 = vector.load %arg4[%c0_23, %c0_24, %c0_25] : memref<2x32x32xf32, #tpu.memory_space<vmem>>, vector<1x32x32xf32>
    %76 = vector.shape_cast %75 : vector<1x32x32xf32> to vector<32x32xf32>
    %cst_26 = arith.constant dense<0.000000e+00> : vector<16x32xf32>
    %77 = tpu.matmul %74, %76, %cst_26 {dimension_numbers = #tpu.dot_dimension_numbers<[1], [0], [0], [1], [0, 0, 1, 1], [], []>} : vector<16x32xf32>, vector<32x32xf32>, vector<16x32xf32> -> vector<16x32xf32>
    %78 = arith.addf %29, %77 : vector<16x32xf32>
    %c0_27 = arith.constant 0 : index
    %c0_28 = arith.constant 0 : index
    %c0_29 = arith.constant 0 : index
    %79 = vector.load %arg5[%c0_27, %c0_28, %c0_29] : memref<2x1x32xf32, #tpu.memory_space<vmem>>, vector<1x1x32xf32>
    %80 = vector.shape_cast %79 : vector<1x1x32xf32> to vector<1x32xf32>
    %81 = vector.broadcast %80 : vector<1x32xf32> to vector<16x32xf32>
    %82 = arith.addf %78, %81 : vector<16x32xf32>
    %c0_30 = arith.constant 0 : index
    %c0_31 = arith.constant 0 : index
    %c0_32 = arith.constant 0 : index
    %83 = vector.load %arg12[%c0_30, %c0_31, %c0_32] : memref<2x1x32xf32, #tpu.memory_space<vmem>>, vector<1x1x32xf32>
    %84 = vector.shape_cast %83 : vector<1x1x32xf32> to vector<1x32xf32>
    %c0_33 = arith.constant 0 : index
    %c0_34 = arith.constant 0 : index
    %c0_35 = arith.constant 0 : index
    %85 = vector.load %arg13[%c0_33, %c0_34, %c0_35] : memref<2x1x32xf32, #tpu.memory_space<vmem>>, vector<1x1x32xf32>
    %86 = vector.shape_cast %85 : vector<1x1x32xf32> to vector<1x32xf32>
    %cst_36 = arith.constant dense<0.000000e+00> : vector<16xf32>
    %87 = vector.multi_reduction <add>, %82, %cst_36 [1] : vector<16x32xf32> to vector<16xf32>
    %88 = vector.shape_cast %87 : vector<16xf32> to vector<16x1xf32>
    %cst_37 = arith.constant 3.200000e+01 : f32
    %89 = vector.broadcast %cst_37 : f32 to vector<16x1xf32>
    %90 = arith.divf %88, %89 : vector<16x1xf32>
    %91 = vector.broadcast %90 : vector<16x1xf32> to vector<16x32xf32>
    %92 = arith.subf %82, %91 : vector<16x32xf32>
    %93 = arith.mulf %92, %92 : vector<16x32xf32>
    %cst_38 = arith.constant dense<0.000000e+00> : vector<16xf32>
    %94 = vector.multi_reduction <add>, %93, %cst_38 [1] : vector<16x32xf32> to vector<16xf32>
    %95 = vector.shape_cast %94 : vector<16xf32> to vector<16x1xf32>
    %cst_39 = arith.constant 3.200000e+01 : f32
    %96 = vector.broadcast %cst_39 : f32 to vector<16x1xf32>
    %97 = arith.divf %95, %96 : vector<16x1xf32>
    %98 = vector.broadcast %90 : vector<16x1xf32> to vector<16x32xf32>
    %99 = arith.subf %82, %98 : vector<16x32xf32>
    %cst_40 = arith.constant 9.99999974E-6 : f32
    %100 = vector.broadcast %cst_40 : f32 to vector<16x1xf32>
    %101 = arith.addf %97, %100 : vector<16x1xf32>
    %102 = math.rsqrt %101 : vector<16x1xf32>
    %103 = vector.broadcast %102 : vector<16x1xf32> to vector<16x32xf32>
    %104 = arith.mulf %99, %103 : vector<16x32xf32>
    %105 = vector.broadcast %84 : vector<1x32xf32> to vector<16x32xf32>
    %106 = arith.mulf %104, %105 : vector<16x32xf32>
    %107 = vector.broadcast %86 : vector<1x32xf32> to vector<16x32xf32>
    %108 = arith.addf %106, %107 : vector<16x32xf32>
    %c0_41 = arith.constant 0 : index
    %c0_42 = arith.constant 0 : index
    %c0_43 = arith.constant 0 : index
    %109 = vector.load %arg6[%c0_41, %c0_42, %c0_43] : memref<2x32x128xf32, #tpu.memory_space<vmem>>, vector<1x32x128xf32>
    %110 = vector.shape_cast %109 : vector<1x32x128xf32> to vector<32x128xf32>
    %cst_44 = arith.constant dense<0.000000e+00> : vector<16x128xf32>
    %111 = tpu.matmul %108, %110, %cst_44 {dimension_numbers = #tpu.dot_dimension_numbers<[1], [0], [0], [1], [0, 0, 1, 1], [], []>} : vector<16x32xf32>, vector<32x128xf32>, vector<16x128xf32> -> vector<16x128xf32>
    %c0_45 = arith.constant 0 : index
    %c0_46 = arith.constant 0 : index
    %c0_47 = arith.constant 0 : index
    %112 = vector.load %arg7[%c0_45, %c0_46, %c0_47] : memref<2x1x128xf32, #tpu.memory_space<vmem>>, vector<1x1x128xf32>
    %113 = vector.shape_cast %112 : vector<1x1x128xf32> to vector<1x128xf32>
    %114 = vector.broadcast %113 : vector<1x128xf32> to vector<16x128xf32>
    %115 = arith.addf %111, %114 : vector<16x128xf32>
    %cst_48 = arith.constant 0.000000e+00 : f32
    %116 = vector.broadcast %cst_48 : f32 to vector<16x128xf32>
    %117 = arith.maximumf %115, %116 : vector<16x128xf32>
    %c0_49 = arith.constant 0 : index
    %c0_50 = arith.constant 0 : index
    %c0_51 = arith.constant 0 : index
    %118 = vector.load %arg8[%c0_49, %c0_50, %c0_51] : memref<2x128x32xf32, #tpu.memory_space<vmem>>, vector<1x128x32xf32>
    %119 = vector.shape_cast %118 : vector<1x128x32xf32> to vector<128x32xf32>
    %cst_52 = arith.constant dense<0.000000e+00> : vector<16x32xf32>
    %120 = tpu.matmul %117, %119, %cst_52 {dimension_numbers = #tpu.dot_dimension_numbers<[1], [0], [0], [1], [0, 0, 1, 1], [], []>} : vector<16x128xf32>, vector<128x32xf32>, vector<16x32xf32> -> vector<16x32xf32>
    %c0_53 = arith.constant 0 : index
    %c0_54 = arith.constant 0 : index
    %c0_55 = arith.constant 0 : index
    %121 = vector.load %arg9[%c0_53, %c0_54, %c0_55] : memref<2x1x32xf32, #tpu.memory_space<vmem>>, vector<1x1x32xf32>
    %122 = vector.shape_cast %121 : vector<1x1x32xf32> to vector<1x32xf32>
    %123 = vector.broadcast %122 : vector<1x32xf32> to vector<16x32xf32>
    %124 = arith.addf %120, %123 : vector<16x32xf32>
    %125 = arith.addf %108, %124 : vector<16x32xf32>
    %c0_56 = arith.constant 0 : index
    %c0_57 = arith.constant 0 : index
    %c0_58 = arith.constant 0 : index
    %126 = vector.load %arg14[%c0_56, %c0_57, %c0_58] : memref<2x1x32xf32, #tpu.memory_space<vmem>>, vector<1x1x32xf32>
    %127 = vector.shape_cast %126 : vector<1x1x32xf32> to vector<1x32xf32>
    %c0_59 = arith.constant 0 : index
    %c0_60 = arith.constant 0 : index
    %c0_61 = arith.constant 0 : index
    %128 = vector.load %arg15[%c0_59, %c0_60, %c0_61] : memref<2x1x32xf32, #tpu.memory_space<vmem>>, vector<1x1x32xf32>
    %129 = vector.shape_cast %128 : vector<1x1x32xf32> to vector<1x32xf32>
    %cst_62 = arith.constant dense<0.000000e+00> : vector<16xf32>
    %130 = vector.multi_reduction <add>, %125, %cst_62 [1] : vector<16x32xf32> to vector<16xf32>
    %131 = vector.shape_cast %130 : vector<16xf32> to vector<16x1xf32>
    %cst_63 = arith.constant 3.200000e+01 : f32
    %132 = vector.broadcast %cst_63 : f32 to vector<16x1xf32>
    %133 = arith.divf %131, %132 : vector<16x1xf32>
    %134 = vector.broadcast %133 : vector<16x1xf32> to vector<16x32xf32>
    %135 = arith.subf %125, %134 : vector<16x32xf32>
    %136 = arith.mulf %135, %135 : vector<16x32xf32>
    %cst_64 = arith.constant dense<0.000000e+00> : vector<16xf32>
    %137 = vector.multi_reduction <add>, %136, %cst_64 [1] : vector<16x32xf32> to vector<16xf32>
    %138 = vector.shape_cast %137 : vector<16xf32> to vector<16x1xf32>
    %cst_65 = arith.constant 3.200000e+01 : f32
    %139 = vector.broadcast %cst_65 : f32 to vector<16x1xf32>
    %140 = arith.divf %138, %139 : vector<16x1xf32>
    %141 = vector.broadcast %133 : vector<16x1xf32> to vector<16x32xf32>
    %142 = arith.subf %125, %141 : vector<16x32xf32>
    %cst_66 = arith.constant 9.99999974E-6 : f32
    %143 = vector.broadcast %cst_66 : f32 to vector<16x1xf32>
    %144 = arith.addf %140, %143 : vector<16x1xf32>
    %145 = math.rsqrt %144 : vector<16x1xf32>
    %146 = vector.broadcast %145 : vector<16x1xf32> to vector<16x32xf32>
    %147 = arith.mulf %142, %146 : vector<16x32xf32>
    %148 = vector.broadcast %127 : vector<1x32xf32> to vector<16x32xf32>
    %149 = arith.mulf %147, %148 : vector<16x32xf32>
    %150 = vector.broadcast %129 : vector<1x32xf32> to vector<16x32xf32>
    %151 = arith.addf %149, %150 : vector<16x32xf32>
    %c1 = arith.constant 1 : index
    %c0_67 = arith.constant 0 : index
    %c0_68 = arith.constant 0 : index
    %152 = vector.load %arg10[%c1, %c0_67, %c0_68] : memref<2x1x32xf32, #tpu.memory_space<vmem>>, vector<1x1x32xf32>
    %153 = vector.shape_cast %152 : vector<1x1x32xf32> to vector<1x32xf32>
    %c1_69 = arith.constant 1 : index
    %c0_70 = arith.constant 0 : index
    %c0_71 = arith.constant 0 : index
    %154 = vector.load %arg11[%c1_69, %c0_70, %c0_71] : memref<2x1x32xf32, #tpu.memory_space<vmem>>, vector<1x1x32xf32>
    %155 = vector.shape_cast %154 : vector<1x1x32xf32> to vector<1x32xf32>
    %cst_72 = arith.constant dense<0.000000e+00> : vector<16xf32>
    %156 = vector.multi_reduction <add>, %151, %cst_72 [1] : vector<16x32xf32> to vector<16xf32>
    %157 = vector.shape_cast %156 : vector<16xf32> to vector<16x1xf32>
    %cst_73 = arith.constant 3.200000e+01 : f32
    %158 = vector.broadcast %cst_73 : f32 to vector<16x1xf32>
    %159 = arith.divf %157, %158 : vector<16x1xf32>
    %160 = vector.broadcast %159 : vector<16x1xf32> to vector<16x32xf32>
    %161 = arith.subf %151, %160 : vector<16x32xf32>
    %162 = arith.mulf %161, %161 : vector<16x32xf32>
    %cst_74 = arith.constant dense<0.000000e+00> : vector<16xf32>
    %163 = vector.multi_reduction <add>, %162, %cst_74 [1] : vector<16x32xf32> to vector<16xf32>
    %164 = vector.shape_cast %163 : vector<16xf32> to vector<16x1xf32>
    %cst_75 = arith.constant 3.200000e+01 : f32
    %165 = vector.broadcast %cst_75 : f32 to vector<16x1xf32>
    %166 = arith.divf %164, %165 : vector<16x1xf32>
    %167 = vector.broadcast %159 : vector<16x1xf32> to vector<16x32xf32>
    %168 = arith.subf %151, %167 : vector<16x32xf32>
    %cst_76 = arith.constant 9.99999974E-6 : f32
    %169 = vector.broadcast %cst_76 : f32 to vector<16x1xf32>
    %170 = arith.addf %166, %169 : vector<16x1xf32>
    %171 = math.rsqrt %170 : vector<16x1xf32>
    %172 = vector.broadcast %171 : vector<16x1xf32> to vector<16x32xf32>
    %173 = arith.mulf %168, %172 : vector<16x32xf32>
    %174 = vector.broadcast %153 : vector<1x32xf32> to vector<16x32xf32>
    %175 = arith.mulf %173, %174 : vector<16x32xf32>
    %176 = vector.broadcast %155 : vector<1x32xf32> to vector<16x32xf32>
    %177 = arith.addf %175, %176 : vector<16x32xf32>
    %c1_77 = arith.constant 1 : index
    %c0_78 = arith.constant 0 : index
    %c0_79 = arith.constant 0 : index
    %178 = vector.load %arg2[%c1_77, %c0_78, %c0_79] : memref<2x32x96xf32, #tpu.memory_space<vmem>>, vector<1x32x96xf32>
    %179 = vector.shape_cast %178 : vector<1x32x96xf32> to vector<32x96xf32>
    %cst_80 = arith.constant dense<0.000000e+00> : vector<16x96xf32>
    %180 = tpu.matmul %177, %179, %cst_80 {dimension_numbers = #tpu.dot_dimension_numbers<[1], [0], [0], [1], [0, 0, 1, 1], [], []>} : vector<16x32xf32>, vector<32x96xf32>, vector<16x96xf32> -> vector<16x96xf32>
    %c1_81 = arith.constant 1 : index
    %c0_82 = arith.constant 0 : index
    %c0_83 = arith.constant 0 : index
    %181 = vector.load %arg3[%c1_81, %c0_82, %c0_83] : memref<2x1x96xf32, #tpu.memory_space<vmem>>, vector<1x1x96xf32>
    %182 = vector.shape_cast %181 : vector<1x1x96xf32> to vector<1x96xf32>
    %183 = vector.broadcast %182 : vector<1x96xf32> to vector<16x96xf32>
    %184 = arith.addf %180, %183 : vector<16x96xf32>
    %185 = vector.shape_cast %184 : vector<16x96xf32> to vector<2x8x96xf32>
    %186 = vector.extract_strided_slice %185 {offsets = [0, 0, 0], sizes = [2, 8, 8], strides = [1, 1, 1]} : vector<2x8x96xf32> to vector<2x8x8xf32>
    %187 = vector.extract_strided_slice %185 {offsets = [0, 0, 8], sizes = [2, 8, 8], strides = [1, 1, 1]} : vector<2x8x96xf32> to vector<2x8x8xf32>
    %188 = vector.extract_strided_slice %185 {offsets = [0, 0, 16], sizes = [2, 8, 8], strides = [1, 1, 1]} : vector<2x8x96xf32> to vector<2x8x8xf32>
    %189 = vector.extract_strided_slice %185 {offsets = [0, 0, 24], sizes = [2, 8, 8], strides = [1, 1, 1]} : vector<2x8x96xf32> to vector<2x8x8xf32>
    %190 = tpu.concatenate %186, %187, %188, %189 in 0 : vector<2x8x8xf32>, vector<2x8x8xf32>, vector<2x8x8xf32>, vector<2x8x8xf32> -> vector<8x8x8xf32>
    %191 = vector.extract_strided_slice %185 {offsets = [0, 0, 32], sizes = [2, 8, 8], strides = [1, 1, 1]} : vector<2x8x96xf32> to vector<2x8x8xf32>
    %192 = vector.extract_strided_slice %185 {offsets = [0, 0, 40], sizes = [2, 8, 8], strides = [1, 1, 1]} : vector<2x8x96xf32> to vector<2x8x8xf32>
    %193 = vector.extract_strided_slice %185 {offsets = [0, 0, 48], sizes = [2, 8, 8], strides = [1, 1, 1]} : vector<2x8x96xf32> to vector<2x8x8xf32>
    %194 = vector.extract_strided_slice %185 {offsets = [0, 0, 56], sizes = [2, 8, 8], strides = [1, 1, 1]} : vector<2x8x96xf32> to vector<2x8x8xf32>
    %195 = tpu.concatenate %191, %192, %193, %194 in 0 : vector<2x8x8xf32>, vector<2x8x8xf32>, vector<2x8x8xf32>, vector<2x8x8xf32> -> vector<8x8x8xf32>
    %196 = vector.extract_strided_slice %185 {offsets = [0, 0, 64], sizes = [2, 8, 8], strides = [1, 1, 1]} : vector<2x8x96xf32> to vector<2x8x8xf32>
    %197 = vector.extract_strided_slice %185 {offsets = [0, 0, 72], sizes = [2, 8, 8], strides = [1, 1, 1]} : vector<2x8x96xf32> to vector<2x8x8xf32>
    %198 = vector.extract_strided_slice %185 {offsets = [0, 0, 80], sizes = [2, 8, 8], strides = [1, 1, 1]} : vector<2x8x96xf32> to vector<2x8x8xf32>
    %199 = vector.extract_strided_slice %185 {offsets = [0, 0, 88], sizes = [2, 8, 8], strides = [1, 1, 1]} : vector<2x8x96xf32> to vector<2x8x8xf32>
    %200 = tpu.concatenate %196, %197, %198, %199 in 0 : vector<2x8x8xf32>, vector<2x8x8xf32>, vector<2x8x8xf32>, vector<2x8x8xf32> -> vector<8x8x8xf32>
    "tpu.trace_start"() <{level = 10 : i32, message = "bid,bjd->bij"}> : () -> ()
    %cst_84 = arith.constant dense<0.000000e+00> : vector<8x8x8xf32>
    %201 = tpu.matmul %190, %195, %cst_84 {dimension_numbers = #tpu.dot_dimension_numbers<[2], [2], [1], [1], [0, 0, 0, 1, 1, 1], [0], [0]>} : vector<8x8x8xf32>, vector<8x8x8xf32>, vector<8x8x8xf32> -> vector<8x8x8xf32>
    %cst_85 = arith.constant -1.000000e+30 : f32
    "tpu.trace_stop"() : () -> ()
    %202 = vector.shape_cast %2 : vector<1x8x8xi1> to vector<1x8x8xi1>
    %203 = vector.broadcast %202 : vector<1x8x8xi1> to vector<8x8x8xi1>
    %204 = vector.broadcast %cst_85 : f32 to vector<8x8x8xf32>
    %205 = arith.select %203, %201, %204 : vector<8x8x8xi1>, vector<8x8x8xf32>
    %cst_86 = arith.constant dense<0xFF800000> : vector<8x8xf32>
    %206 = vector.multi_reduction <maximumf>, %205, %cst_86 [2] : vector<8x8x8xf32> to vector<8x8xf32>
    %207 = vector.shape_cast %206 : vector<8x8xf32> to vector<8x8x1xf32>
    %208 = vector.broadcast %207 : vector<8x8x1xf32> to vector<8x8x8xf32>
    %209 = arith.subf %205, %208 : vector<8x8x8xf32>
    %210 = math.exp %209 : vector<8x8x8xf32>
    %cst_87 = arith.constant dense<0.000000e+00> : vector<8x8xf32>
    %211 = vector.multi_reduction <add>, %210, %cst_87 [2] : vector<8x8x8xf32> to vector<8x8xf32>
    %212 = vector.shape_cast %211 : vector<8x8xf32> to vector<8x8x1xf32>
    %213 = tpu.reciprocal %212 {approx = true} : vector<8x8x1xf32> -> vector<8x8x1xf32>
    %214 = vector.broadcast %213 : vector<8x8x1xf32> to vector<8x8x8xf32>
    %215 = arith.mulf %210, %214 : vector<8x8x8xf32>
    "tpu.trace_start"() <{level = 10 : i32, message = "bij,bjd->bid"}> : () -> ()
    %cst_88 = arith.constant dense<0.000000e+00> : vector<8x8x8xf32>
    %216 = tpu.matmul %215, %200, %cst_88 {dimension_numbers = #tpu.dot_dimension_numbers<[2], [1], [1], [2], [0, 0, 0, 1, 1, 2], [0], [0]>} : vector<8x8x8xf32>, vector<8x8x8xf32>, vector<8x8x8xf32> -> vector<8x8x8xf32>
    "tpu.trace_stop"() : () -> ()
    %217 = vector.extract_strided_slice %216 {offsets = [0, 0, 0], sizes = [2, 8, 8], strides = [1, 1, 1]} : vector<8x8x8xf32> to vector<2x8x8xf32>
    %218 = vector.extract_strided_slice %216 {offsets = [2, 0, 0], sizes = [2, 8, 8], strides = [1, 1, 1]} : vector<8x8x8xf32> to vector<2x8x8xf32>
    %219 = vector.extract_strided_slice %216 {offsets = [4, 0, 0], sizes = [2, 8, 8], strides = [1, 1, 1]} : vector<8x8x8xf32> to vector<2x8x8xf32>
    %220 = vector.extract_strided_slice %216 {offsets = [6, 0, 0], sizes = [2, 8, 8], strides = [1, 1, 1]} : vector<8x8x8xf32> to vector<2x8x8xf32>
    %221 = tpu.concatenate %217, %218, %219, %220 in 2 : vector<2x8x8xf32>, vector<2x8x8xf32>, vector<2x8x8xf32>, vector<2x8x8xf32> -> vector<2x8x32xf32>
    %222 = vector.shape_cast %221 : vector<2x8x32xf32> to vector<16x32xf32>
    %c1_89 = arith.constant 1 : index
    %c0_90 = arith.constant 0 : index
    %c0_91 = arith.constant 0 : index
    %223 = vector.load %arg4[%c1_89, %c0_90, %c0_91] : memref<2x32x32xf32, #tpu.memory_space<vmem>>, vector<1x32x32xf32>
    %224 = vector.shape_cast %223 : vector<1x32x32xf32> to vector<32x32xf32>
    %cst_92 = arith.constant dense<0.000000e+00> : vector<16x32xf32>
    %225 = tpu.matmul %222, %224, %cst_92 {dimension_numbers = #tpu.dot_dimension_numbers<[1], [0], [0], [1], [0, 0, 1, 1], [], []>} : vector<16x32xf32>, vector<32x32xf32>, vector<16x32xf32> -> vector<16x32xf32>
    %226 = arith.addf %177, %225 : vector<16x32xf32>
    %c1_93 = arith.constant 1 : index
    %c0_94 = arith.constant 0 : index
    %c0_95 = arith.constant 0 : index
    %227 = vector.load %arg5[%c1_93, %c0_94, %c0_95] : memref<2x1x32xf32, #tpu.memory_space<vmem>>, vector<1x1x32xf32>
    %228 = vector.shape_cast %227 : vector<1x1x32xf32> to vector<1x32xf32>
    %229 = vector.broadcast %228 : vector<1x32xf32> to vector<16x32xf32>
    %230 = arith.addf %226, %229 : vector<16x32xf32>
    %c1_96 = arith.constant 1 : index
    %c0_97 = arith.constant 0 : index
    %c0_98 = arith.constant 0 : index
    %231 = vector.load %arg12[%c1_96, %c0_97, %c0_98] : memref<2x1x32xf32, #tpu.memory_space<vmem>>, vector<1x1x32xf32>
    %232 = vector.shape_cast %231 : vector<1x1x32xf32> to vector<1x32xf32>
    %c1_99 = arith.constant 1 : index
    %c0_100 = arith.constant 0 : index
    %c0_101 = arith.constant 0 : index
    %233 = vector.load %arg13[%c1_99, %c0_100, %c0_101] : memref<2x1x32xf32, #tpu.memory_space<vmem>>, vector<1x1x32xf32>
    %234 = vector.shape_cast %233 : vector<1x1x32xf32> to vector<1x32xf32>
    %cst_102 = arith.constant dense<0.000000e+00> : vector<16xf32>
    %235 = vector.multi_reduction <add>, %230, %cst_102 [1] : vector<16x32xf32> to vector<16xf32>
    %236 = vector.shape_cast %235 : vector<16xf32> to vector<16x1xf32>
    %cst_103 = arith.constant 3.200000e+01 : f32
    %237 = vector.broadcast %cst_103 : f32 to vector<16x1xf32>
    %238 = arith.divf %236, %237 : vector<16x1xf32>
    %239 = vector.broadcast %238 : vector<16x1xf32> to vector<16x32xf32>
    %240 = arith.subf %230, %239 : vector<16x32xf32>
    %241 = arith.mulf %240, %240 : vector<16x32xf32>
    %cst_104 = arith.constant dense<0.000000e+00> : vector<16xf32>
    %242 = vector.multi_reduction <add>, %241, %cst_104 [1] : vector<16x32xf32> to vector<16xf32>
    %243 = vector.shape_cast %242 : vector<16xf32> to vector<16x1xf32>
    %cst_105 = arith.constant 3.200000e+01 : f32
    %244 = vector.broadcast %cst_105 : f32 to vector<16x1xf32>
    %245 = arith.divf %243, %244 : vector<16x1xf32>
    %246 = vector.broadcast %238 : vector<16x1xf32> to vector<16x32xf32>
    %247 = arith.subf %230, %246 : vector<16x32xf32>
    %cst_106 = arith.constant 9.99999974E-6 : f32
    %248 = vector.broadcast %cst_106 : f32 to vector<16x1xf32>
    %249 = arith.addf %245, %248 : vector<16x1xf32>
    %250 = math.rsqrt %249 : vector<16x1xf32>
    %251 = vector.broadcast %250 : vector<16x1xf32> to vector<16x32xf32>
    %252 = arith.mulf %247, %251 : vector<16x32xf32>
    %253 = vector.broadcast %232 : vector<1x32xf32> to vector<16x32xf32>
    %254 = arith.mulf %252, %253 : vector<16x32xf32>
    %255 = vector.broadcast %234 : vector<1x32xf32> to vector<16x32xf32>
    %256 = arith.addf %254, %255 : vector<16x32xf32>
    %c1_107 = arith.constant 1 : index
    %c0_108 = arith.constant 0 : index
    %c0_109 = arith.constant 0 : index
    %257 = vector.load %arg6[%c1_107, %c0_108, %c0_109] : memref<2x32x128xf32, #tpu.memory_space<vmem>>, vector<1x32x128xf32>
    %258 = vector.shape_cast %257 : vector<1x32x128xf32> to vector<32x128xf32>
    %cst_110 = arith.constant dense<0.000000e+00> : vector<16x128xf32>
    %259 = tpu.matmul %256, %258, %cst_110 {dimension_numbers = #tpu.dot_dimension_numbers<[1], [0], [0], [1], [0, 0, 1, 1], [], []>} : vector<16x32xf32>, vector<32x128xf32>, vector<16x128xf32> -> vector<16x128xf32>
    %c1_111 = arith.constant 1 : index
    %c0_112 = arith.constant 0 : index
    %c0_113 = arith.constant 0 : index
    %260 = vector.load %arg7[%c1_111, %c0_112, %c0_113] : memref<2x1x128xf32, #tpu.memory_space<vmem>>, vector<1x1x128xf32>
    %261 = vector.shape_cast %260 : vector<1x1x128xf32> to vector<1x128xf32>
    %262 = vector.broadcast %261 : vector<1x128xf32> to vector<16x128xf32>
    %263 = arith.addf %259, %262 : vector<16x128xf32>
    %cst_114 = arith.constant 0.000000e+00 : f32
    %264 = vector.broadcast %cst_114 : f32 to vector<16x128xf32>
    %265 = arith.maximumf %263, %264 : vector<16x128xf32>
    %c1_115 = arith.constant 1 : index
    %c0_116 = arith.constant 0 : index
    %c0_117 = arith.constant 0 : index
    %266 = vector.load %arg8[%c1_115, %c0_116, %c0_117] : memref<2x128x32xf32, #tpu.memory_space<vmem>>, vector<1x128x32xf32>
    %267 = vector.shape_cast %266 : vector<1x128x32xf32> to vector<128x32xf32>
    %cst_118 = arith.constant dense<0.000000e+00> : vector<16x32xf32>
    %268 = tpu.matmul %265, %267, %cst_118 {dimension_numbers = #tpu.dot_dimension_numbers<[1], [0], [0], [1], [0, 0, 1, 1], [], []>} : vector<16x128xf32>, vector<128x32xf32>, vector<16x32xf32> -> vector<16x32xf32>
    %c1_119 = arith.constant 1 : index
    %c0_120 = arith.constant 0 : index
    %c0_121 = arith.constant 0 : index
    %269 = vector.load %arg9[%c1_119, %c0_120, %c0_121] : memref<2x1x32xf32, #tpu.memory_space<vmem>>, vector<1x1x32xf32>
    %270 = vector.shape_cast %269 : vector<1x1x32xf32> to vector<1x32xf32>
    %271 = vector.broadcast %270 : vector<1x32xf32> to vector<16x32xf32>
    %272 = arith.addf %268, %271 : vector<16x32xf32>
    %273 = arith.addf %256, %272 : vector<16x32xf32>
    %c1_122 = arith.constant 1 : index
    %c0_123 = arith.constant 0 : index
    %c0_124 = arith.constant 0 : index
    %274 = vector.load %arg14[%c1_122, %c0_123, %c0_124] : memref<2x1x32xf32, #tpu.memory_space<vmem>>, vector<1x1x32xf32>
    %275 = vector.shape_cast %274 : vector<1x1x32xf32> to vector<1x32xf32>
    %c1_125 = arith.constant 1 : index
    %c0_126 = arith.constant 0 : index
    %c0_127 = arith.constant 0 : index
    %276 = vector.load %arg15[%c1_125, %c0_126, %c0_127] : memref<2x1x32xf32, #tpu.memory_space<vmem>>, vector<1x1x32xf32>
    %277 = vector.shape_cast %276 : vector<1x1x32xf32> to vector<1x32xf32>
    %cst_128 = arith.constant dense<0.000000e+00> : vector<16xf32>
    %278 = vector.multi_reduction <add>, %273, %cst_128 [1] : vector<16x32xf32> to vector<16xf32>
    %279 = vector.shape_cast %278 : vector<16xf32> to vector<16x1xf32>
    %cst_129 = arith.constant 3.200000e+01 : f32
    %280 = vector.broadcast %cst_129 : f32 to vector<16x1xf32>
    %281 = arith.divf %279, %280 : vector<16x1xf32>
    %282 = vector.broadcast %281 : vector<16x1xf32> to vector<16x32xf32>
    %283 = arith.subf %273, %282 : vector<16x32xf32>
    %284 = arith.mulf %283, %283 : vector<16x32xf32>
    %cst_130 = arith.constant dense<0.000000e+00> : vector<16xf32>
    %285 = vector.multi_reduction <add>, %284, %cst_130 [1] : vector<16x32xf32> to vector<16xf32>
    %286 = vector.shape_cast %285 : vector<16xf32> to vector<16x1xf32>
    %cst_131 = arith.constant 3.200000e+01 : f32
    %287 = vector.broadcast %cst_131 : f32 to vector<16x1xf32>
    %288 = arith.divf %286, %287 : vector<16x1xf32>
    %289 = vector.broadcast %281 : vector<16x1xf32> to vector<16x32xf32>
    %290 = arith.subf %273, %289 : vector<16x32xf32>
    %cst_132 = arith.constant 9.99999974E-6 : f32
    %291 = vector.broadcast %cst_132 : f32 to vector<16x1xf32>
    %292 = arith.addf %288, %291 : vector<16x1xf32>
    %293 = math.rsqrt %292 : vector<16x1xf32>
    %294 = vector.broadcast %293 : vector<16x1xf32> to vector<16x32xf32>
    %295 = arith.mulf %290, %294 : vector<16x32xf32>
    %296 = vector.broadcast %275 : vector<1x32xf32> to vector<16x32xf32>
    %297 = arith.mulf %295, %296 : vector<16x32xf32>
    %298 = vector.broadcast %277 : vector<1x32xf32> to vector<16x32xf32>
    %299 = arith.addf %297, %298 : vector<16x32xf32>
    %c0_133 = arith.constant 0 : index
    %c0_134 = arith.constant 0 : index
    %300 = vector.load %arg16[%c0_133, %c0_134] : memref<32x128xf32, #tpu.memory_space<vmem>>, vector<32x128xf32>
    %cst_135 = arith.constant dense<0.000000e+00> : vector<16x128xf32>
    %301 = tpu.matmul %299, %300, %cst_135 {dimension_numbers = #tpu.dot_dimension_numbers<[1], [0], [0], [1], [0, 0, 1, 1], [], []>} : vector<16x32xf32>, vector<32x128xf32>, vector<16x128xf32> -> vector<16x128xf32>
    %c0_136 = arith.constant 0 : index
    %c0_137 = arith.constant 0 : index
    %302 = vector.load %arg17[%c0_136, %c0_137] : memref<1x128xf32, #tpu.memory_space<vmem>>, vector<1x128xf32>
    %303 = vector.broadcast %302 : vector<1x128xf32> to vector<16x128xf32>
    %304 = arith.addf %301, %303 : vector<16x128xf32>
    %c0_138 = arith.constant 0 : index
    %c0_139 = arith.constant 0 : index
    %305 = vector.load %arg18[%c0_138, %c0_139] : memref<16x128xf32, #tpu.memory_space<vmem>>, vector<16x128xf32>
    tpu.vector_store %arg18[%c0_138, %c0_139], %304 {strides = array<i32>} : memref<16x128xf32, #tpu.memory_space<vmem>>, vector<16x128xf32>,
    %cst_140 = arith.constant dense<0xFF800000> : vector<16xf32>
    %306 = vector.multi_reduction <maximumf>, %304, %cst_140 [1] : vector<16x128xf32> to vector<16xf32>
    %307 = vector.shape_cast %306 : vector<16xf32> to vector<16x1xf32>
    %308 = vector.broadcast %307 : vector<16x1xf32> to vector<16x128xf32>
    %309 = arith.subf %304, %308 : vector<16x128xf32>
    %310 = math.exp %309 : vector<16x128xf32>
    %cst_141 = arith.constant dense<0.000000e+00> : vector<16xf32>
    %311 = vector.multi_reduction <add>, %310, %cst_141 [1] : vector<16x128xf32> to vector<16xf32>
    %312 = vector.shape_cast %311 : vector<16xf32> to vector<16x1xf32>
    %313 = math.log %312 : vector<16x1xf32>
    %314 = tpu.iota {dimensions = array<i32: 1>} : vector<16x128xi32>
    %c0_142 = arith.constant 0 : index
    %c0_143 = arith.constant 0 : index
    %315 = vector.load %arg1[%c0_142, %c0_143] : memref<16x1xi32, #tpu.memory_space<vmem>>, vector<16x1xi32>
    %316 = vector.broadcast %315 : vector<16x1xi32> to vector<16x128xi32>
    %317 = arith.cmpi eq, %314, %316 : vector<16x128xi32>
    %cst_144 = arith.constant 0.000000e+00 : f32
    %318 = vector.broadcast %cst_144 : f32 to vector<16x128xf32>
    %319 = arith.select %317, %309, %318 : vector<16x128xi1>, vector<16x128xf32>
    %cst_145 = arith.constant dense<0.000000e+00> : vector<16xf32>
    %320 = vector.multi_reduction <add>, %319, %cst_145 [1] : vector<16x128xf32> to vector<16xf32>
    %321 = vector.shape_cast %320 : vector<16xf32> to vector<16x1xf32>
    %322 = arith.subf %313, %321 : vector<16x1xf32>
    %cst_146 = arith.constant dense<0.000000e+00> : vector<1xf32>
    %323 = vector.multi_reduction <add>, %322, %cst_146 [0] : vector<16x1xf32> to vector<1xf32>
    %324 = vector.shape_cast %323 : vector<1xf32> to vector<1x1xf32>
    %cst_147 = arith.constant 6.250000e-02 : f32
    %325 = vector.broadcast %cst_147 : f32 to vector<1x1xf32>
    %326 = arith.mulf %324, %325 : vector<1x1xf32>
    %c0_148 = arith.constant 0 : index
    %c0_149 = arith.constant 0 : index
    %327 = vector.load %arg19[%c0_148, %c0_149] : memref<1x1xf32, #tpu.memory_space<vmem>>, vector<1x1xf32>
    tpu.vector_store %arg19[%c0_148, %c0_149], %326 {strides = array<i32>} : memref<1x1xf32, #tpu.memory_space<vmem>>, vector<1x1xf32>,
    return
  }
}

</mosaic_0001>

<bundles_post_ra>
// kernel: tpu_custom_call.1
= control target key start
LH: loop header
LB: loop body
LE: loop exit
PB: predicated region body
PF: predicated region fallthrough
CT: control target
= control target key end

     0   :  { %s3073_s0 = inlined_call_operand.vmem [shape: f32[16,32], index: 0, kind: input, shape index: {}]   ;;  %s3074_s1 = inlined_call_operand.vmem [shape: s32[16,1], index: 1, kind: input, shape index: {}]   ;;  %s3075_s2 = inlined_call_operand.vmem [shape: f32[2,32,96], index: 2, kind: input, shape index: {}]   ;;  %s3076_s3 = inlined_call_operand.vmem [shape: f32[2,1,96], index: 3, kind: input, shape index: {}]   ;;  %s3077_s4 = inlined_call_operand.vmem [shape: f32[2,32,32], index: 4, kind: input, shape index: {}]   ;;  %s3078_s5 = inlined_call_operand.vmem [shape: f32[2,1,32], index: 5, kind: input, shape index: {}]   ;;  %s3079_s6 = inlined_call_operand.vmem [shape: f32[2,32,128], index: 6, kind: input, shape index: {}]   ;;  %s3080_s7 = inlined_call_operand.vmem [shape: f32[2,1,128], index: 7, kind: input, shape index: {}]   ;;  %s3081_s8 = inlined_call_operand.vmem [shape: f32[2,128,32], index: 8, kind: input, shape index: {}]   ;;  %s3082_s9 = inlined_call_operand.vmem [shape: f32[2,1,32], index: 9, kind: input, shape index: {}]   ;;  %s3083_s10 = inlined_call_operand.vmem [shape: f32[2,1,32], index: 10, kind: input, shape index: {}]   ;;  %s3084_s11 = inlined_call_operand.vmem [shape: f32[2,1,32], index: 11, kind: input, shape index: {}]   ;;  %s3085_s12 = inlined_call_operand.vmem [shape: f32[2,1,32], index: 12, kind: input, shape index: {}]   ;;  %s3086_s13 = inlined_call_operand.vmem [shape: f32[2,1,32], index: 13, kind: input, shape index: {}]   ;;  %s3087_s14 = inlined_call_operand.vmem [shape: f32[2,1,32], index: 14, kind: input, shape index: {}]   ;;  %s3088_s15 = inlined_call_operand.vmem [shape: f32[2,1,32], index: 15, kind: input, shape index: {}]   ;;  %s3089_s16 = inlined_call_operand.vmem [shape: f32[32,128], index: 16, kind: input, shape index: {}]   ;;  %s3090_s17 = inlined_call_operand.vmem [shape: f32[1,128], index: 17, kind: input, shape index: {}]   ;;  %s3091_s18 = inlined_call_operand.hbm [shape: f32[16,128], index: 18, kind: output, shape index: {0}]   ;;  %s3092_s19 = inlined_call_operand.hbm [shape: f32[1,1], index: 19, kind: output, shape index: {1}]  }
   0x1   :  { %3105 = sst [smem:[#allocation8_spill]] %s3073_s0 }
   0x2   :  { %3106 = sst [smem:[#allocation9_spill]] %s3074_s1 }
   0x3   :  { %3107 = sst [smem:[#allocation10_spill]] %s3075_s2 }
   0x4   :  { %3108 = sst [smem:[#allocation11_spill]] %s3076_s3 }
   0x5   :  { %25 = vsyncpa [#allocation3], 0  ;;  %s3109_s20 = sld [smem:[#allocation8_spill]]  ;;  %vm72_vm0 = vcmask 261120  }
   0xb   :  { %v68_v0 = vld [vmem:[%s3109_s20] sm:$0xff]  ;;  %v69_v1 = vld [vmem:[%s3109_s20 + $0x8] sm:$0xff] }
   0xc   :  { %v73_v2 = vsel %vm72_vm0, %v68_v0, 0.0  ;;  %v76_v3 = vsel %vm72_vm0, %v69_v1, 0.0 }
   0xd   :  { %74 = vadd.xlane.f32.xlu0 %v73_v2 }
   0xe   :  { %26 = vsyncpa [#allocation5], 0  ;;  %v2305_v4 = vmov 32.0   ;;  %s3110_s23 = sld [smem:[#allocation10_spill]]  ;;  %v2134_v39 = vld [vmem:[%s3083_s10] ss:$0 sm:$0xff] }
   0xf   :  { %2155 = vrcp.f32 %v2305_v4  ;;  %v2135_v43 = vld [vmem:[%s3084_s11] ss:$0 sm:$0xff]  ;;  %s3111_s22 = sld [smem:[#allocation11_spill]]  ;;  %s2306_s2 = smov 120   ;;  %vm187_vm8 = vcmask 64512   ;;  %vm726_vm10 = vcmask 130048  }
  0x10   :  { %s2307_s24 = smov 112   ;;  %s2308_s25 = smov 104   ;;  %vm729_vm11 = vcmask 195584  }
  0x11   :  { %s2309_s3 = smov 96   ;;  %s3097_s26 = smov 64  }
  0x12   :  { %s3103_s27 = smov 8   ;;  %s3101_s28 = smov 24  }
  0x13   :  { %s3099_s30 = smov 16   ;;  %s2315_s21 = smov [#allocation2]  }
  0x14   :  { %v137_v21 = vld [vmem:[%s3110_s23 + $0x18] sm:$0xff]  ;;  %v136_v22 = vld [vmem:[%s3110_s23 + $0x10] sm:$0xff]  ;;  %v135_v23 = vld [vmem:[%s3110_s23 + $0x8] sm:$0xff] }
  0x15   :  { %77 = vadd.xlane.f32.xlu0 %v76_v3  ;;  %v2156_v5 = vpop.eup %2155  ;;  %160 = vmatpush.msra.mxu0 %v137_v21  ;;  %v134_v24 = vld [vmem:[%s3110_s23] sm:$0xff] }
  0x16   :  { %v80_v6 = vmul.f32 32.0, %v2156_v5  ;;  %vm84_vm1 = vweird.f32 %v2156_v5  ;;  %v2136_v53 = vld [vmem:[%s3111_s22] ss:$0 sm:$0xff] }
  0x17   :  { %161 = vmatpush.msra.mxu0 %v136_v22 }
  0x18   :  { %v81_v7 = vsub.f32 1.0, %v80_v6 }
  0x19   :  { %162 = vmatpush.msra.mxu0 %v135_v23 }
  0x1a   :  { %v82_v8 = vmul.f32 %v2156_v5, %v81_v7 }
  0x1b   :  { %163 = vmatpush.msra.mxu0 %v134_v24 }
  0x1c   :  { %v83_v9 = vadd.f32 %v2156_v5, %v82_v8  ;;  %v63_v8 = vlaneseq }
  0x1e   :  { %v2426_v10 = vsel %vm84_vm1, %v2156_v5, %v83_v9  ;;  %v64_v9 = vshrl.u32 %v63_v8, 7 }
  0x80   :  { %v75_v11 = vpop.xlane.xlu0 %74 }
  0x81   :  { %v86_v12 = vmul.f32 %v2426_v10, %v75_v11  ;;  %v2531_v11 = vand.u32 127, %v63_v8 }
  0x83   :  { %v88_v13 = vsub.f32 %v68_v0, %v86_v12  ;;  %vm2534_vm9 = vcmp.le.s32.totalorder %v2531_v11, %v64_v9 }
  0x85   :  { %v90_v14 = vmul.f32 %v88_v13, %v88_v13 }
  0x87   :  { %v92_v15 = vsel %vm72_vm0, %v90_v14, 0.0 }
  0x88   :  { %93 = vadd.xlane.f32.xlu1 %v92_v15  ;;  %v78_v16 = vpop.xlane.xlu0 %77 }
  0x89   :  { %v87_v17 = vmul.f32 %v2426_v10, %v78_v16 }
  0x8b   :  { %v89_v18 = vsub.f32 %v69_v1, %v87_v17 }
  0x8d   :  { %v91_v19 = vmul.f32 %v89_v18, %v89_v18 }
  0x8f   :  { %v95_v20 = vsel %vm72_vm0, %v91_v19, 0.0 }
  0x90   :  { %96 = vadd.xlane.f32.xlu1 %v95_v20 }
  0xfb   :  { %v94_v25 = vpop.xlane.xlu1 %93 }
  0xfc   :  { %v98_v26 = vmul.f32 %v94_v25, %v2426_v10 }
  0xfe   :  { %v100_v27 = vadd.f32 1e-05, %v98_v26 }
 0x100   :  { %2157 = vrsqrt.f32 %v100_v27  ;;  %vm108_vm3 = vweird.f32 %v100_v27 }
 0x103   :  { %v97_v28 = vpop.xlane.xlu1 %96 }
 0x104   :  { %v99_v29 = vmul.f32 %v97_v28, %v2426_v10 }
 0x106   :  { %v2158_v30 = vpop.eup %2157  ;;  %v101_v31 = vadd.f32 1e-05, %v99_v29 }
 0x107   :  { %v103_v32 = vmul.f32 %v2158_v30, %v100_v27  ;;  %vm109_vm2 = vweird.f32 %v2158_v30 }
 0x108   :  { %2159 = vrsqrt.f32 %v101_v31  ;;  %vm110_vm4 = vmor %vm108_vm3, %vm109_vm2  ;;  %vm118_vm6 = vweird.f32 %v101_v31 }
 0x109   :  { %v104_v33 = vmul.f32 %v2158_v30, %v103_v32 }
 0x10b   :  { %v105_v34 = vmul.f32 0.5, %v104_v33 }
 0x10d   :  { %v106_v35 = vsub.f32 1.5, %v105_v34 }
 0x10e   :  { %v2160_v36 = vpop.eup %2159 }
 0x10f   :  { %v107_v37 = vmul.f32 %v2158_v30, %v106_v35  ;;  %v113_v38 = vmul.f32 %v2160_v36, %v101_v31  ;;  %vm119_vm5 = vweird.f32 %v2160_v36 }
 0x110   :  { %vm120_vm7 = vmor %vm118_vm6, %vm119_vm5 }
 0x111   :  { %v111_v40 = vsel %vm110_vm4, %v2158_v30, %v107_v37  ;;  %v114_v41 = vmul.f32 %v2160_v36, %v113_v38 }
 0x112   :  { %v122_v42 = vmul.f32 %v111_v40, %v88_v13 }
 0x113   :  { %v115_v44 = vmul.f32 0.5, %v114_v41 }
 0x114   :  { %v127_v45 = vmul.f32 %v2134_v39, %v122_v42 }
 0x115   :  { %v116_v46 = vsub.f32 1.5, %v115_v44 }
 0x116   :  { %v2452_v47 = vadd.f32 %v2135_v43, %v127_v45 }
 0x117   :  { %v117_v48 = vmul.f32 %v2160_v36, %v116_v46 }
 0x118   :  { %1988 = vmatmul.msk.f32.vlgmr.msra.gmra.mxu0 %vm72_vm0, %v2452_v47 }
 0x119   :  { %v121_v49 = vsel %vm120_vm7, %v2160_v36, %v117_v48 }
 0x11a   :  { %v123_v50 = vmul.f32 %v121_v49, %v89_v18 }
 0x11c   :  { %v128_v51 = vmul.f32 %v2134_v39, %v123_v50 }
 0x11e   :  { %v2456_v52 = vadd.f32 %v2135_v43, %v128_v51 }
 0x120   :  { %1989 = vmatmul.msk.f32.gmra.mxu0 %vm72_vm0, %v2456_v52 }
 0x195   :  { %v165_v54 = vpop.f32.mrf.mxu0 }
 0x196   :  { %v2463_v55 = vadd.f32 %v2136_v53, %v165_v54 }
 0x198   :  { %173 = vrot.lane.b32.xlu2 %v2463_v55, %s2306_s2 }
 0x19d   :  { %v168_v56 = vpop.f32.mrf.mxu0 }
 0x19e   :  { %v2467_v57 = vadd.f32 %v2136_v53, %v168_v56 }
 0x1a0   :  { %177 = vrot.lane.b32.xlu2 %v2463_v55, %s2307_s24  ;;  %183 = vrot.lane.b32.xlu1 %v2467_v57, %s2308_s25 }
 0x1a1   :  { %175 = vrot.lane.b32.xlu0 %v2467_v57, %s2306_s2 }
 0x1a8   :  { %181 = vrot.lane.b32.xlu2 %v2463_v55, %s2308_s25 }
 0x1a9   :  { %185 = vrot.lane.b32.xlu0 %v2463_v55, %s2309_s3 }
 0x1b0   :  { %179 = vrot.lane.b32.xlu2 %v2467_v57, %s2307_s24 }
 0x1b8   :  { %212 = vrot.lane.b32.xlu2 %v2467_v57, %s2309_s3 }
 0x1f2   :  { %v2483_v58 = vpop.permute.xlu2 %173 }
 0x1f3   :  { %238 = vrot.lane.b32.xlu2 %v2483_v58, %s2309_s3  ;;  %v2101_v48 = vpack.i.bf16 %v2483_v58, %v2463_v55 }
 0x1fa   :  { %v2487_v59 = vpop.permute.xlu2 %177 }
 0x1fb   :  { %290 = vrot.lane.b32.xlu1 %v2487_v59, %s2309_s3 }
 0x202   :  { %v2491_v60 = vpop.permute.xlu2 %181 }
 0x203   :  { %342 = vrot.lane.b32.xlu1 %v2491_v60, %s2309_s3 }
 0x20a   :  { %v2495_v61 = vpop.permute.xlu2 %179 }
 0x212   :  { %v213_v62 = vpop.permute.xlu2 %212  ;;  %v2497_v63 = vpop.permute.xlu1 %183 }
 0x213   :  { %v2499_v0 = vpop.permute.xlu0 %175  ;;  %1992 = vmatpush.xpose.msk.msra.mxu3 %vm187_vm8, %v213_v62  ;;  %368 = vrot.lane.b32.xlu2 %v2497_v63, %s2309_s3 }
 0x214   :  { %264 = vrot.lane.b32.xlu0 %v2499_v0, %s2309_s3 }
 0x216   :  { %1993 = vmatmul.msk.f32.vlgmr.msra.gmra.mxu3 %vm187_vm8, %v2467_v57 }
 0x21b   :  { %v186_v1 = vpop.permute.xlu0 %185 }
 0x21c   :  { %316 = vrot.lane.b32.xlu0 %v2495_v61, %s2309_s3  ;;  %1990 = vmatpush.xpose.msk.msra.mxu1 %vm187_vm8, %v186_v1  ;;  %v2111_v1 = vpack.i.bf16 %v2491_v60, %v2467_v57 }
 0x21f   :  { %1991 = vmatmul.msk.f32.vlgmr.msra.gmra.mxu1 %vm187_vm8, %v2463_v55 }
 0x24d   :  { %v239_v2 = vpop.permute.xlu2 %238 }
 0x24e   :  { %1994 = vmatpush.xpose.msk.msrb.mxu3 %vm187_vm8, %v239_v2 }
 0x251   :  { %1995 = vmatmul.msk.f32.vlgmr.msrb.gmra.mxu3 %vm187_vm8, %v2483_v58 }
 0x26d   :  { %v369_v3 = vpop.permute.xlu2 %368  ;;  %v291_v4 = vpop.permute.xlu1 %290 }
 0x26e   :  { %1998 = vmatpush.xpose.msk.msra.mxu2 %vm187_vm8, %v291_v4 }
 0x271   :  { %1999 = vmatmul.msk.f32.vlgmr.msra.gmra.mxu2 %vm187_vm8, %v2487_v59 }
 0x272   :  { %2004 = vmatpush.xpose.msk.msrb.mxu2 %vm187_vm8, %v369_v3 }
 0x275   :  { %v343_v6 = vpop.permute.xlu1 %342 }
 0x279   :  { %2005 = vmatmul.msk.f32.vlgmr.msrb.gmra.mxu2 %vm187_vm8, %v2497_v63 }
 0x286   :  { %v265_v5 = vpop.permute.xlu0 %264 }
 0x287   :  { %1996 = vmatpush.xpose.msk.msrb.mxu1 %vm187_vm8, %v265_v5 }
 0x28a   :  { %1997 = vmatmul.msk.f32.vlgmr.msrb.gmra.mxu1 %vm187_vm8, %v2499_v0 }
 0x28b   :  { %2002 = vmatpush.xpose.msk.msra.mxu1 %vm187_vm8, %v343_v6 }
 0x28e   :  { %v317_v7 = vpop.permute.xlu0 %316 }
 0x28f   :  { %2000 = vmatpush.xpose.msk.msra.mxu3 %vm187_vm8, %v317_v7 }
 0x292   :  { %2001 = vmatmul.msk.f32.vlgmr.msra.gmra.mxu3 %vm187_vm8, %v2495_v61  ;;  %2003 = vmatmul.msk.f32.vlgmr.msra.gmra.mxu1 %vm187_vm8, %v2491_v60 }
 0x299   :  { %v235_v13 = vpop.f32.mrf.mxu3 }
 0x29a   :  { %v397_v14 = vsel %vm2534_vm9, %v235_v13, -1e+30 }
 0x29b   :  { %v407_v15 = vsel %vm187_vm8, %v397_v14, -inf }
 0x29c   :  { %v209_v16 = vpop.f32.mrf.mxu1  ;;  %408 = vmax.xlane.f32.xlu1 %v407_v15 }
 0x29d   :  { %v396_v17 = vsel %vm2534_vm9, %v209_v16, -1e+30 }
 0x29e   :  { %v404_v18 = vsel %vm187_vm8, %v396_v17, -inf }
 0x29f   :  { %405 = vmax.xlane.f32.xlu2 %v404_v18 }
 0x2d4   :  { %v261_v19 = vpop.f32.mrf.mxu3 }
 0x2d5   :  { %v398_v20 = vsel %vm2534_vm9, %v261_v19, -1e+30 }
 0x2d6   :  { %v410_v21 = vsel %vm187_vm8, %v398_v20, -inf }
 0x2d7   :  { %411 = vmax.xlane.f32.xlu1 %v410_v21 }
 0x2f4   :  { %v313_v22 = vpop.f32.mrf.mxu2 }
 0x2f5   :  { %v400_v23 = vsel %vm2534_vm9, %v313_v22, -1e+30 }
 0x2f6   :  { %v416_v24 = vsel %vm187_vm8, %v400_v23, -inf }
 0x2f7   :  { %417 = vmax.xlane.f32.xlu0 %v416_v24 }
 0x2fc   :  { %v391_v28 = vpop.f32.mrf.mxu2 }
 0x2fd   :  { %v403_v29 = vsel %vm2534_vm9, %v391_v28, -1e+30 }
 0x2fe   :  { %v425_v32 = vsel %vm187_vm8, %v403_v29, -inf }
 0x307   :  { %v287_v25 = vpop.f32.mrf.mxu1 }
 0x308   :  { %v399_v26 = vsel %vm2534_vm9, %v287_v25, -1e+30 }
 0x309   :  { %v413_v27 = vsel %vm187_vm8, %v399_v26, -inf }
 0x30a   :  { %414 = vmax.xlane.f32.xlu2 %v413_v27 }
 0x30f   :  { %v409_v30 = vpop.xlane.xlu1 %408  ;;  %v365_v44 = vpop.f32.mrf.mxu1 }
 0x310   :  { %v429_v31 = vsub.f32 %v397_v14, %v409_v30  ;;  %v402_v45 = vsel %vm2534_vm9, %v365_v44, -1e+30 }
 0x311   :  { %v422_v46 = vsel %vm187_vm8, %v402_v45, -inf }
 0x312   :  { %v438_v33 = vmul.f32 1.442695, %v429_v31  ;;  %426 = vmax.xlane.f32.xlu2 %v425_v32  ;;  %v406_v34 = vpop.xlane.xlu2 %405 }
 0x313   :  { %v428_v35 = vsub.f32 %v396_v17, %v406_v34 }
 0x314   :  { %2161 = vpow2.f32 %v438_v33 }
 0x315   :  { %v436_v36 = vmul.f32 1.442695, %v428_v35  ;;  %v339_v37 = vpop.f32.mrf.mxu3 }
 0x316   :  { %v401_v38 = vsel %vm2534_vm9, %v339_v37, -1e+30 }
 0x317   :  { %2163 = vpow2.f32 %v436_v36  ;;  %v419_v39 = vsel %vm187_vm8, %v401_v38, -inf }
 0x318   :  { %420 = vmax.xlane.f32.xlu1 %v419_v39 }
 0x31a   :  { %v2559_v40 = vpop.eup %2161 }
 0x31b   :  { %v455_v43 = vsel %vm187_vm8, %v2559_v40, 0.0 }
 0x31d   :  { %v2164_v41 = vpop.eup %2163 }
 0x31e   :  { %v452_v42 = vsel %vm187_vm8, %v2164_v41, 0.0 }
 0x31f   :  { %453 = vadd.xlane.f32.xlu0 %v452_v42 }
 0x320   :  { %456 = vadd.xlane.f32.xlu1 %v455_v43 }
 0x327   :  { %423 = vmax.xlane.f32.xlu0 %v422_v46 }
 0x32a   :  { %2102 = vrot.lane.b32.xlu2 %v2101_v48, %s3097_s26 }
 0x34a   :  { %v412_v49 = vpop.xlane.xlu1 %411 }
 0x34b   :  { %v430_v50 = vsub.f32 %v398_v20, %v412_v49 }
 0x34d   :  { %v440_v51 = vmul.f32 1.442695, %v430_v50 }
 0x34f   :  { %2165 = vpow2.f32 %v440_v51 }
 0x355   :  { %v2166_v53 = vpop.eup %2165 }
 0x356   :  { %v458_v54 = vsel %vm187_vm8, %v2166_v53, 0.0 }
 0x357   :  { %459 = vadd.xlane.f32.xlu2 %v458_v54 }
 0x36a   :  { %v418_v56 = vpop.xlane.xlu0 %417 }
 0x36b   :  { %v432_v62 = vsub.f32 %v400_v23, %v418_v56 }
 0x36d   :  { %v444_v2 = vmul.f32 1.442695, %v432_v62 }
 0x36f   :  { %2167 = vpow2.f32 %v444_v2  ;;  %2112 = vrot.lane.b32.xlu2 %v2111_v1, %s3097_s26 }
 0x375   :  { %v2574_v55 = vpop.eup %2167 }
 0x376   :  { %v464_v58 = vsel %vm187_vm8, %v2574_v55, 0.0 }
 0x377   :  { %465 = vadd.xlane.f32.xlu1 %v464_v58  ;;  %622 = vrot.lane.b32.xlu2 %v2495_v61, %s3097_s26 }
 0x37d   :  { %v415_v3 = vpop.xlane.xlu2 %414 }
 0x37e   :  { %v431_v4 = vsub.f32 %v399_v26, %v415_v3  ;;  %v735_v3 = vld [vmem:[%s3077_s4 + $0x18] sm:$0xff] }
 0x380   :  { %v442_v5 = vmul.f32 1.442695, %v431_v4 }
 0x382   :  { %2169 = vpow2.f32 %v442_v5 }
 0x385   :  { %v427_v6 = vpop.xlane.xlu2 %426 }
 0x386   :  { %v435_v7 = vsub.f32 %v403_v29, %v427_v6  ;;  %v2106_v29 = vpack.i.bf16 %v2499_v0, %v2487_v59 }
 0x388   :  { %v2580_v57 = vpop.eup %2169  ;;  %v450_v60 = vmul.f32 1.442695, %v435_v7 }
 0x389   :  { %v461_v8 = vsel %vm187_vm8, %v2580_v57, 0.0 }
 0x38a   :  { %2171 = vpow2.f32 %v450_v60  ;;  %462 = vadd.xlane.f32.xlu0 %v461_v8  ;;  %v734_v60 = vld [vmem:[%s3077_s4 + $0x10] sm:$0xff]  ;;  %v733_v8 = vld [vmem:[%s3077_s4 + $0x8] sm:$0xff] }
 0x38b   :  { %v421_v9 = vpop.xlane.xlu1 %420 }
 0x38c   :  { %v433_v13 = vsub.f32 %v401_v38, %v421_v9  ;;  %v732_v9 = vld [vmem:[%s3077_s4] sm:$0xff] }
 0x38d   :  { %v2103_v14 = vpop.permute.xlu2 %2102 }
 0x38e   :  { %v446_v15 = vmul.f32 1.442695, %v433_v13  ;;  %v2105_v16 = vunpack.i.h.bf16 %v2103_v14  ;;  %v2104_v61 = vunpack.i.l.bf16 %v2103_v14 }
 0x390   :  { %v2584_v17 = vpop.eup %2171  ;;  %2173 = vpow2.f32 %v446_v15  ;;  %513 = vmatpush.msrb.mxu3 %v2104_v61  ;;  %565 = vmatpush.msrb.mxu1 %v2105_v16 }
 0x391   :  { %v473_v18 = vsel %vm187_vm8, %v2584_v17, 0.0 }
 0x392   :  { %v454_v19 = vpop.xlane.xlu0 %453  ;;  %474 = vadd.xlane.f32.xlu1 %v473_v18 }
 0x393   :  { %2175 = vrcp.f32 %v454_v19  ;;  %v457_v30 = vpop.xlane.xlu1 %456 }
 0x396   :  { %v2174_v20 = vpop.eup %2173 }
 0x397   :  { %v467_v22 = vsel %vm187_vm8, %v2174_v20, 0.0 }
 0x399   :  { %v2176_v21 = vpop.eup %2175 }
 0x39a   :  { %v484_v23 = vmul.f32 %v2176_v21, %v2164_v41  ;;  %v424_v24 = vpop.xlane.xlu0 %423  ;;  %468 = vadd.xlane.f32.xlu1 %v467_v22 }
 0x39b   :  { %v434_v25 = vsub.f32 %v402_v45, %v424_v24  ;;  %v2137_v24 = vld [vmem:[%s3078_s5] ss:$0 sm:$0xff] }
 0x39c   :  { %2006 = vmatmul.msk.f32.vlgmr.msrb.gmra.mxu3 %vm187_vm8, %v484_v23 }
 0x39d   :  { %v448_v26 = vmul.f32 1.442695, %v434_v25 }
 0x39f   :  { %2177 = vpow2.f32 %v448_v26 }
 0x3a0   :  { %2179 = vrcp.f32 %v457_v30 }
 0x3a5   :  { %v2178_v27 = vpop.eup %2177 }
 0x3a6   :  { %v470_v28 = vsel %vm187_vm8, %v2178_v27, 0.0  ;;  %v2180_v32 = vpop.eup %2179 }
 0x3a7   :  { %471 = vadd.xlane.f32.xlu0 %v470_v28  ;;  %v485_v38 = vmul.f32 %v2180_v32, %v2559_v40 }
 0x3b3   :  { %674 = vrot.lane.b32.xlu1 %v2497_v63, %s3097_s26 }
 0x3bb   :  { %2107 = vrot.lane.b32.xlu0 %v2106_v29, %s3097_s26  ;;  %s3118_s26 = sld [smem:[#allocation9_spill]] }
 0x3ca   :  { %v460_v31 = vpop.xlane.xlu2 %459 }
 0x3cb   :  { %2181 = vrcp.f32 %v460_v31 }
 0x3d1   :  { %v2182_v33 = vpop.eup %2181 }
 0x3d2   :  { %v486_v34 = vmul.f32 %v2182_v33, %v2166_v53  ;;  %v2113_v35 = vpop.permute.xlu2 %2112 }
 0x3d3   :  { %v2115_v36 = vunpack.i.h.bf16 %v2113_v35  ;;  %v2114_v37 = vunpack.i.l.bf16 %v2113_v35 }
 0x3d4   :  { %2008 = vmatmul.msk.f32.vlgmr.msrb.gmra.mxu1 %vm187_vm8, %v486_v34 }
 0x3d5   :  { %539 = vmatpush.msrb.mxu0 %v2114_v37  ;;  %669 = vmatpush.msra.mxu1 %v2115_v36 }
 0x3d6   :  { %2007 = vmatmul.msk.f32.vlgmr.msrb.gmra.mxu0 %vm187_vm8, %v485_v38 }
 0x3da   :  { %v623_v59 = vpop.permute.xlu2 %622 }
 0x3db   :  { %643 = vmatpush.msra.mxu0 %v623_v59 }
 0x3ea   :  { %v466_v63 = vpop.xlane.xlu1 %465 }
 0x3fd   :  { %v463_v41 = vpop.xlane.xlu0 %462 }
 0x405   :  { %v475_v0 = vpop.xlane.xlu1 %474 }
 0x40d   :  { %v469_v39 = vpop.xlane.xlu1 %468 }
 0x40e   :  { %2183 = vrcp.f32 %v469_v39  ;;  %v831_v39 = vld [vmem:[%s3079_s6 + $0x10] sm:$0xff] }
 0x414   :  { %v2184_v42 = vpop.eup %2183 }
 0x415   :  { %v489_v43 = vmul.f32 %v2184_v42, %v2174_v20  ;;  %v829_v42 = vld [vmem:[%s3079_s6] sm:$0xff] }
 0x417   :  { %2011 = vmatmul.msk.f32.vlgmr.msra.gmra.mxu0 %vm187_vm8, %v489_v43 }
 0x41a   :  { %v472_v44 = vpop.xlane.xlu0 %471 }
 0x41b   :  { %2185 = vrcp.f32 %v472_v44 }
 0x41c   :  { %2187 = vrcp.f32 %v466_v63 }
 0x41d   :  { %2189 = vrcp.f32 %v463_v41  ;;  %v830_v41 = vld [vmem:[%s3079_s6 + $0x8] sm:$0xff] }
 0x41e   :  { %2191 = vrcp.f32 %v475_v0  ;;  %v832_v0 = vld [vmem:[%s3079_s6 + $0x18] sm:$0xff] }
 0x41f   :  { %v515_v5 = vpop.f32.mrf.mxu3 }
 0x421   :  { %v2186_v45 = vpop.eup %2185 }
 0x422   :  { %v490_v46 = vmul.f32 %v2186_v45, %v2178_v27  ;;  %v2188_v40 = vpop.eup %2187 }
 0x423   :  { %v2190_v48 = vpop.eup %2189  ;;  %v488_v53 = vmul.f32 %v2188_v40, %v2574_v55 }
 0x424   :  { %2012 = vmatmul.msk.f32.vlgmr.msra.gmra.mxu1 %vm187_vm8, %v490_v46  ;;  %v487_v54 = vmul.f32 %v2190_v48, %v2580_v57  ;;  %v2192_v62 = vpop.eup %2191 }
 0x425   :  { %v675_v56 = vpop.permute.xlu1 %674  ;;  %v491_v1 = vmul.f32 %v2192_v62, %v2584_v17  ;;  %v2139_v62 = vld [vmem:[%s3086_s13] ss:$0 sm:$0xff] }
 0x42d   :  { %v2108_v49 = vpop.permute.xlu0 %2107 }
 0x42e   :  { %v2110_v50 = vunpack.i.h.bf16 %v2108_v49  ;;  %v2109_v51 = vunpack.i.l.bf16 %v2108_v49 }
 0x430   :  { %591 = vmatpush.msra.mxu2 %v2110_v50  ;;  %617 = vmatpush.msra.mxu3 %v2109_v51 }
 0x431   :  { %2009 = vmatmul.msk.f32.vlgmr.msra.gmra.mxu2 %vm187_vm8, %v487_v54  ;;  %2010 = vmatmul.msk.f32.vlgmr.msra.gmra.mxu3 %vm187_vm8, %v488_v53  ;;  %v2138_v53 = vld [vmem:[%s3085_s12] ss:$0 sm:$0xff] }
 0x432   :  { %695 = vmatpush.msrb.mxu2 %v675_v56  ;;  %754 = vmatpush.msrb.mxu3 %v735_v3 }
 0x434   :  { %755 = vmatpush.msrb.mxu3 %v734_v60  ;;  %855 = vmatpush.msra.mxu2 %v832_v0  ;;  %v878_v60 = vld [vmem:[%s3081_s8 + $0x50] sm:$0xff] }
 0x436   :  { %756 = vmatpush.msrb.mxu3 %v733_v8  ;;  %856 = vmatpush.msra.mxu2 %v831_v39  ;;  %v877_v8 = vld [vmem:[%s3081_s8 + $0x48] sm:$0xff] }
 0x438   :  { %757 = vmatpush.msrb.mxu3 %v732_v9  ;;  %857 = vmatpush.msra.mxu2 %v830_v41  ;;  %v876_v9 = vld [vmem:[%s3081_s8 + $0x40] sm:$0xff] }
 0x439   :  { %2013 = vmatmul.msk.f32.vlgmr.msrb.gmra.mxu2 %vm187_vm8, %v491_v1  ;;  %v883_v1 = vld [vmem:[%s3081_s8 + $0x78] sm:$0xff] }
 0x43a   :  { %858 = vmatpush.msra.mxu2 %v829_v42  ;;  %888 = vmatpush.msrb.mxu1 %v883_v1 }
 0x451   :  { %v567_v2 = vpop.f32.mrf.mxu1 }
 0x452   :  { %702 = vrot.lane.b32.xlu0 %v567_v2, %s3103_s27  ;;  %v882_v2 = vld [vmem:[%s3081_s8 + $0x70] sm:$0xff] }
 0x453   :  { %v541_v55 = vpop.f32.mrf.mxu0  ;;  %889 = vmatpush.msrb.mxu1 %v882_v2 }
 0x494   :  { %v645_v4 = vpop.f32.mrf.mxu0 }
 0x4a1   :  { %v671_v58 = vpop.f32.mrf.mxu1 }
 0x4a2   :  { %718 = vrot.lane.b32.xlu0 %v671_v58, %s3101_s28  ;;  %v881_v58 = vld [vmem:[%s3081_s8 + $0x68] sm:$0xff] }
 0x4a3   :  { %890 = vmatpush.msrb.mxu1 %v881_v58 }
 0x4aa   :  { %712 = vrot.lane.b32.xlu0 %v645_v4, %s3099_s30 }
 0x4b4   :  { %v593_v6 = vpop.f32.mrf.mxu2  ;;  %v619_v7 = vpop.f32.mrf.mxu3 }
 0x4b5   :  { %710 = vrot.lane.b32.xlu2 %v619_v7, %s3099_s30 }
 0x4bc   :  { %v697_v57 = vpop.f32.mrf.mxu2 }
 0x4bd   :  { %720 = vrot.lane.b32.xlu1 %v697_v57, %s3101_s28  ;;  %704 = vrot.lane.b32.xlu2 %v593_v6, %s3103_s27  ;;  %v880_v6 = vld [vmem:[%s3081_s8 + $0x60] sm:$0xff]  ;;  %v879_v57 = vld [vmem:[%s3081_s8 + $0x58] sm:$0xff] }
 0x4be   :  { %891 = vmatpush.msrb.mxu1 %v880_v6 }
 0x4c0   :  { %892 = vmatpush.msrb.mxu1 %v879_v57 }
 0x4c2   :  { %893 = vmatpush.msrb.mxu1 %v878_v60 }
 0x4c4   :  { %v703_v13 = vpop.permute.xlu0 %702  ;;  %894 = vmatpush.msrb.mxu1 %v877_v8 }
 0x4c5   :  { %v724_v15 = vsel %vm187_vm8, %v515_v5, %v703_v13 }
 0x4c6   :  { %895 = vmatpush.msrb.mxu1 %v876_v9 }
 0x50f   :  { %v711_v14 = vpop.permute.xlu2 %710 }
 0x510   :  { %v727_v16 = vsel %vm726_vm10, %v724_v15, %v711_v14  ;;  %v875_v14 = vld [vmem:[%s3081_s8 + $0x38] sm:$0xff] }
 0x511   :  { %896 = vmatpush.msrb.mxu1 %v875_v14 }
 0x514   :  { %v719_v61 = vpop.permute.xlu0 %718 }
 0x515   :  { %v730_v17 = vsel %vm729_vm11, %v727_v16, %v719_v61  ;;  %v874_v16 = vld [vmem:[%s3081_s8 + $0x30] sm:$0xff] }
 0x516   :  { %2014 = vmatmul.msk.f32.vlgmr.msrb.gmra.mxu3 %vm72_vm0, %v730_v17  ;;  %v873_v17 = vld [vmem:[%s3081_s8 + $0x28] sm:$0xff]  ;;  %897 = vmatpush.msrb.mxu1 %v874_v16 }
 0x517   :  { %v705_v18 = vpop.permute.xlu2 %704 }
 0x518   :  { %v725_v20 = vsel %vm187_vm8, %v541_v55, %v705_v18  ;;  %898 = vmatpush.msrb.mxu1 %v873_v17 }
 0x51c   :  { %v713_v19 = vpop.permute.xlu0 %712 }
 0x51d   :  { %v728_v21 = vsel %vm726_vm10, %v725_v20, %v713_v19  ;;  %v872_v19 = vld [vmem:[%s3081_s8 + $0x20] sm:$0xff] }
 0x51e   :  { %899 = vmatpush.msrb.mxu1 %v872_v19 }
 0x52f   :  { %v721_v22 = vpop.permute.xlu1 %720 }
 0x530   :  { %v731_v23 = vsel %vm729_vm11, %v728_v21, %v721_v22  ;;  %v871_v21 = vld [vmem:[%s3081_s8 + $0x18] sm:$0xff] }
 0x531   :  { %2015 = vmatmul.msk.f32.gmra.mxu3 %vm72_vm0, %v731_v23  ;;  %900 = vmatpush.msrb.mxu1 %v871_v21 }
 0x599   :  { %v759_v25 = vpop.f32.mrf.mxu3 }
 0x59a   :  { %v765_v26 = vadd.f32 %v759_v25, %v2452_v47 }
 0x59c   :  { %v771_v27 = vadd.f32 %v2137_v24, %v765_v26 }
 0x59e   :  { %v775_v28 = vsel %vm72_vm0, %v771_v27, 0.0 }
 0x59f   :  { %776 = vadd.xlane.f32.xlu2 %v775_v28  ;;  %v869_v28 = vld [vmem:[%s3081_s8 + $0x8] sm:$0xff] }
 0x5b4   :  { %v762_v29 = vpop.f32.mrf.mxu3 }
 0x5b5   :  { %v766_v30 = vadd.f32 %v762_v29, %v2456_v52  ;;  %v868_v29 = vld [vmem:[%s3081_s8] sm:$0xff] }
 0x5b7   :  { %v772_v31 = vadd.f32 %v2137_v24, %v766_v30  ;;  %v2140_v30 = vld [vmem:[%s3080_s7] ss:$0 sm:$0xff] }
 0x5b9   :  { %v778_v32 = vsel %vm72_vm0, %v772_v31, 0.0 }
 0x5ba   :  { %779 = vadd.xlane.f32.xlu0 %v778_v32 }
 0x612   :  { %v777_v33 = vpop.xlane.xlu2 %776 }
 0x613   :  { %v781_v34 = vmul.f32 %v777_v33, %v2426_v10 }
 0x615   :  { %v783_v35 = vsub.f32 %v771_v27, %v781_v34  ;;  %v870_v27 = vld [vmem:[%s3081_s8 + $0x10] sm:$0xff] }
 0x616   :  { %901 = vmatpush.msrb.mxu1 %v870_v27 }
 0x617   :  { %v785_v36 = vmul.f32 %v783_v35, %v783_v35 }
 0x618   :  { %902 = vmatpush.msrb.mxu1 %v869_v28 }
 0x619   :  { %v787_v37 = vsel %vm72_vm0, %v785_v36, 0.0 }
 0x61a   :  { %788 = vadd.xlane.f32.xlu1 %v787_v37  ;;  %903 = vmatpush.msrb.mxu1 %v868_v29  ;;  %v2141_v37 = vld [vmem:[%s3082_s9] ss:$0 sm:$0xff] }
 0x62d   :  { %v780_v47 = vpop.xlane.xlu0 %779 }
 0x62e   :  { %v782_v38 = vmul.f32 %v780_v47, %v2426_v10 }
 0x630   :  { %v2643_v59 = vsub.f32 %v772_v31, %v782_v38 }
 0x632   :  { %v786_v52 = vmul.f32 %v2643_v59, %v2643_v59 }
 0x634   :  { %v790_v63 = vsel %vm72_vm0, %v786_v52, 0.0 }
 0x635   :  { %791 = vadd.xlane.f32.xlu2 %v790_v63 }
 0x68d   :  { %v789_v43 = vpop.xlane.xlu1 %788 }
 0x68e   :  { %v793_v44 = vmul.f32 %v789_v43, %v2426_v10 }
 0x690   :  { %v795_v45 = vadd.f32 1e-05, %v793_v44 }
 0x692   :  { %2193 = vrsqrt.f32 %v795_v45  ;;  %vm803_vm13 = vweird.f32 %v795_v45 }
 0x698   :  { %v2194_v46 = vpop.eup %2193 }
 0x699   :  { %v798_v40 = vmul.f32 %v2194_v46, %v795_v45  ;;  %vm804_vm12 = vweird.f32 %v2194_v46 }
 0x69a   :  { %vm805_vm14 = vmor %vm803_vm13, %vm804_vm12 }
 0x69b   :  { %v799_v48 = vmul.f32 %v2194_v46, %v798_v40 }
 0x69d   :  { %v800_v49 = vmul.f32 0.5, %v799_v48 }
 0x69f   :  { %v801_v50 = vsub.f32 1.5, %v800_v49 }
 0x6a1   :  { %v802_v51 = vmul.f32 %v2194_v46, %v801_v50 }
 0x6a3   :  { %v806_v54 = vsel %vm805_vm14, %v2194_v46, %v802_v51 }
 0x6a4   :  { %v817_v56 = vmul.f32 %v806_v54, %v783_v35 }
 0x6a6   :  { %v822_v55 = vmul.f32 %v2138_v53, %v817_v56 }
 0x6a8   :  { %v792_v3 = vpop.xlane.xlu2 %791  ;;  %v827_v4 = vadd.f32 %v2139_v62, %v822_v55 }
 0x6a9   :  { %v794_v5 = vmul.f32 %v792_v3, %v2426_v10 }
 0x6aa   :  { %2016 = vmatmul.msk.f32.vlgmr.msra.gmra.mxu2 %vm72_vm0, %v827_v4 }
 0x6ab   :  { %v796_v7 = vadd.f32 1e-05, %v794_v5 }
 0x6ad   :  { %2195 = vrsqrt.f32 %v796_v7  ;;  %vm813_vm1 = vweird.f32 %v796_v7 }
 0x6b3   :  { %v2196_v13 = vpop.eup %2195 }
 0x6b4   :  { %v808_v15 = vmul.f32 %v2196_v13, %v796_v7  ;;  %vm814_vm15 = vweird.f32 %v2196_v13  ;;  %v2143_v7 = vld [vmem:[%s3088_s15] ss:$0 sm:$0xff] }
 0x6b5   :  { %vm815_vm2 = vmor %vm813_vm1, %vm814_vm15 }
 0x6b6   :  { %v809_v61 = vmul.f32 %v2196_v13, %v808_v15 }
 0x6b8   :  { %v810_v18 = vmul.f32 0.5, %v809_v61 }
 0x6ba   :  { %v811_v20 = vsub.f32 1.5, %v810_v18 }
 0x6bc   :  { %v812_v22 = vmul.f32 %v2196_v13, %v811_v20 }
 0x6be   :  { %v816_v23 = vsel %vm815_vm2, %v2196_v13, %v812_v22 }
 0x6bf   :  { %v818_v24 = vmul.f32 %v816_v23, %v2643_v59 }
 0x6c1   :  { %v823_v25 = vmul.f32 %v2138_v53, %v818_v24 }
 0x6c3   :  { %v828_v26 = vadd.f32 %v2139_v62, %v823_v25 }
 0x6c5   :  { %2017 = vmatmul.msk.f32.gmra.mxu2 %vm72_vm0, %v828_v26 }
 0x72d   :  { %v860_v31 = vpop.f32.mrf.mxu2 }
 0x72e   :  { %v861_v32 = vadd.f32 %v2140_v30, %v860_v31 }
 0x730   :  { %v866_v33 = vmax.f32 %v861_v32, 0.0 }
 0x732   :  { %904 = vmatmul.f32.vlgmr.msrb.gmra.mxu1 %v866_v33 }
 0x748   :  { %v863_v34 = vpop.f32.mrf.mxu2 }
 0x749   :  { %v864_v35 = vadd.f32 %v2140_v30, %v863_v34 }
 0x74b   :  { %v867_v36 = vmax.f32 %v864_v35, 0.0  ;;  %v2023_v35 = vld [vmem:[%s3110_s23 + $0x38] sm:$0xff] }
 0x74c   :  { %1055 = vmatpush.msrb.mxu2 %v2023_v35 }
 0x74d   :  { %907 = vmatmul.f32.gmra.mxu1 %v867_v36  ;;  %v2022_v36 = vld [vmem:[%s3110_s23 + $0x30] sm:$0xff] }
 0x74e   :  { %1056 = vmatpush.msrb.mxu2 %v2022_v36 }
 0x7af   :  { %v905_v47 = vpop.f32.mrf.mxu1 }
 0x7b0   :  { %v906_v38 = vadd.f32 %v2141_v37, %v905_v47  ;;  %v2020_v47 = vld [vmem:[%s3110_s23 + $0x20] sm:$0xff] }
 0x7b2   :  { %v911_v59 = vadd.f32 %v906_v38, %v827_v4  ;;  %v2142_v4 = vld [vmem:[%s3087_s14] ss:$0 sm:$0xff] }
 0x7b4   :  { %v915_v52 = vsel %vm72_vm0, %v911_v59, 0.0 }
 0x7b5   :  { %916 = vadd.xlane.f32.xlu0 %v915_v52 }
 0x7ca   :  { %v908_v63 = vpop.f32.mrf.mxu1 }
 0x7cb   :  { %v909_v0 = vadd.f32 %v2141_v37, %v908_v63  ;;  %v2021_v37 = vld [vmem:[%s3110_s23 + $0x28] sm:$0xff]  ;;  %s1960_s23 = sshll.u32 %s3091_s18, 4  ;;  %s2317_s18 = smov [#allocation4]   ;;  %s1961_s23 = int_to_ptr.hbm [resolvable:$true] %s1960_s23 }
 0x7cc   :  { %1057 = vmatpush.msrb.mxu2 %v2021_v37 }
 0x7cd   :  { %v912_v39 = vadd.f32 %v909_v0, %v828_v26 }
 0x7ce   :  { %1058 = vmatpush.msrb.mxu2 %v2020_v47 }
 0x7cf   :  { %v918_v41 = vsel %vm72_vm0, %v912_v39, 0.0 }
 0x7d0   :  { %919 = vadd.xlane.f32.xlu1 %v918_v41 }
 0x828   :  { %v917_v42 = vpop.xlane.xlu0 %916 }
 0x829   :  { %v921_v43 = vmul.f32 %v917_v42, %v2426_v10 }
 0x82b   :  { %v923_v44 = vsub.f32 %v911_v59, %v921_v43 }
 0x82d   :  { %v925_v45 = vmul.f32 %v923_v44, %v923_v44 }
 0x82f   :  { %v927_v46 = vsel %vm72_vm0, %v925_v45, 0.0 }
 0x830   :  { %928 = vadd.xlane.f32.xlu2 %v927_v46 }
 0x843   :  { %v920_v40 = vpop.xlane.xlu1 %919 }
 0x844   :  { %v922_v48 = vmul.f32 %v920_v40, %v2426_v10  ;;  %v2145_v40 = vld [vmem:[%s3084_s11 + $0x1] ss:$0 sm:$0xff]  ;;  %s2316_s11 = smov 128  }
 0x846   :  { %v924_v49 = vsub.f32 %v912_v39, %v922_v48 }
 0x848   :  { %v926_v50 = vmul.f32 %v924_v49, %v924_v49 }
 0x84a   :  { %v930_v51 = vsel %vm72_vm0, %v926_v50, 0.0 }
 0x84b   :  { %931 = vadd.xlane.f32.xlu0 %v930_v51 }
 0x8a3   :  { %v929_v53 = vpop.xlane.xlu2 %928 }
 0x8a4   :  { %v933_v54 = vmul.f32 %v929_v53, %v2426_v10 }
 0x8a6   :  { %v935_v56 = vadd.f32 1e-05, %v933_v54 }
 0x8a8   :  { %2197 = vrsqrt.f32 %v935_v56  ;;  %vm943_vm4 = vweird.f32 %v935_v56 }
 0x8ae   :  { %v2198_v62 = vpop.eup %2197 }
 0x8af   :  { %v938_v1 = vmul.f32 %v2198_v62, %v935_v56  ;;  %vm944_vm3 = vweird.f32 %v2198_v62 }
 0x8b0   :  { %vm945_vm5 = vmor %vm943_vm4, %vm944_vm3 }
 0x8b1   :  { %v939_v2 = vmul.f32 %v2198_v62, %v938_v1 }
 0x8b3   :  { %v940_v55 = vmul.f32 0.5, %v939_v2 }
 0x8b5   :  { %v941_v58 = vsub.f32 1.5, %v940_v55 }
 0x8b7   :  { %v942_v3 = vmul.f32 %v2198_v62, %v941_v58 }
 0x8b9   :  { %v946_v5 = vsel %vm945_vm5, %v2198_v62, %v942_v3 }
 0x8ba   :  { %v957_v6 = vmul.f32 %v946_v5, %v923_v44  ;;  %v2144_v44 = vld [vmem:[%s3083_s10 + $0x1] ss:$0 sm:$0xff]  ;;  %s1958_s10 = sshll.u32 %s2315_s21, 4  ;;  %s1959_s10 = int_to_ptr.vmem [resolvable:$true] %s1958_s10 }
 0x8bc   :  { %v962_v57 = vmul.f32 %v2142_v4, %v957_v6  ;;  %v2146_v6 = vld [vmem:[%s3111_s22 + $0x1] ss:$0 sm:$0xff]  ;;  %s3114_s22 = smov 64  }
 0x8be   :  { %v932_v60 = vpop.xlane.xlu0 %931  ;;  %v967_v8 = vadd.f32 %v2143_v7, %v962_v57 }
 0x8bf   :  { %v934_v9 = vmul.f32 %v932_v60, %v2426_v10 }
 0x8c0   :  { %v973_v13 = vsel %vm72_vm0, %v967_v8, 0.0 }
 0x8c1   :  { %v936_v14 = vadd.f32 1e-05, %v934_v9  ;;  %974 = vadd.xlane.f32.xlu1 %v973_v13 }
 0x8c3   :  { %2199 = vrsqrt.f32 %v936_v14  ;;  %vm953_vm7 = vweird.f32 %v936_v14 }
 0x8c9   :  { %v2200_v15 = vpop.eup %2199 }
 0x8ca   :  { %v948_v16 = vmul.f32 %v2200_v15, %v936_v14  ;;  %vm954_vm6 = vweird.f32 %v2200_v15 }
 0x8cb   :  { %vm955_vm12 = vmor %vm953_vm7, %vm954_vm6 }
 0x8cc   :  { %v949_v61 = vmul.f32 %v2200_v15, %v948_v16 }
 0x8ce   :  { %v950_v17 = vmul.f32 0.5, %v949_v61 }
 0x8d0   :  { %v951_v18 = vsub.f32 1.5, %v950_v17 }
 0x8d2   :  { %v952_v19 = vmul.f32 %v2200_v15, %v951_v18 }
 0x8d4   :  { %v956_v20 = vsel %vm955_vm12, %v2200_v15, %v952_v19 }
 0x8d5   :  { %v958_v21 = vmul.f32 %v956_v20, %v924_v49 }
 0x8d7   :  { %v963_v22 = vmul.f32 %v2142_v4, %v958_v21 }
 0x8d9   :  { %v968_v23 = vadd.f32 %v2143_v7, %v963_v22 }
 0x8db   :  { %v976_v24 = vsel %vm72_vm0, %v968_v23, 0.0 }
 0x8dc   :  { %977 = vadd.xlane.f32.xlu2 %v976_v24 }
 0x934   :  { %v975_v25 = vpop.xlane.xlu1 %974 }
 0x935   :  { %v979_v26 = vmul.f32 %v975_v25, %v2426_v10 }
 0x937   :  { %v981_v27 = vsub.f32 %v967_v8, %v979_v26 }
 0x939   :  { %v983_v28 = vmul.f32 %v981_v27, %v981_v27 }
 0x93b   :  { %v985_v29 = vsel %vm72_vm0, %v983_v28, 0.0 }
 0x93c   :  { %986 = vadd.xlane.f32.xlu0 %v985_v29 }
 0x94f   :  { %v978_v30 = vpop.xlane.xlu2 %977 }
 0x950   :  { %v980_v31 = vmul.f32 %v978_v30, %v2426_v10 }
 0x952   :  { %v982_v32 = vsub.f32 %v968_v23, %v980_v31 }
 0x954   :  { %v984_v33 = vmul.f32 %v982_v32, %v982_v32 }
 0x956   :  { %v988_v34 = vsel %vm72_vm0, %v984_v33, 0.0 }
 0x957   :  { %989 = vadd.xlane.f32.xlu1 %v988_v34 }
 0x9af   :  { %v987_v38 = vpop.xlane.xlu0 %986 }
 0x9b0   :  { %v991_v59 = vmul.f32 %v987_v38, %v2426_v10 }
 0x9b2   :  { %v993_v52 = vadd.f32 1e-05, %v991_v59 }
 0x9b4   :  { %2201 = vrsqrt.f32 %v993_v52  ;;  %vm1001_vm14 = vweird.f32 %v993_v52 }
 0x9ba   :  { %v2202_v63 = vpop.eup %2201 }
 0x9bb   :  { %v996_v0 = vmul.f32 %v2202_v63, %v993_v52  ;;  %vm1002_vm13 = vweird.f32 %v2202_v63 }
 0x9bc   :  { %vm1003_vm15 = vmor %vm1001_vm14, %vm1002_vm13 }
 0x9bd   :  { %v997_v39 = vmul.f32 %v2202_v63, %v996_v0 }
 0x9bf   :  { %v998_v41 = vmul.f32 0.5, %v997_v39 }
 0x9c1   :  { %v999_v42 = vsub.f32 1.5, %v998_v41 }
 0x9c3   :  { %v1000_v43 = vmul.f32 %v2202_v63, %v999_v42 }
 0x9c5   :  { %v1004_v45 = vsel %vm1003_vm15, %v2202_v63, %v1000_v43 }
 0x9c6   :  { %v1015_v46 = vmul.f32 %v1004_v45, %v981_v27 }
 0x9c8   :  { %v1020_v48 = vmul.f32 %v2144_v44, %v1015_v46 }
 0x9ca   :  { %v990_v49 = vpop.xlane.xlu1 %989  ;;  %v2764_v50 = vadd.f32 %v2145_v40, %v1020_v48 }
 0x9cb   :  { %v992_v51 = vmul.f32 %v990_v49, %v2426_v10 }
 0x9cc   :  { %2025 = vmatmul.msk.f32.vlgmr.msrb.gmra.mxu2 %vm72_vm0, %v2764_v50 }
 0x9cd   :  { %v994_v53 = vadd.f32 1e-05, %v992_v51 }
 0x9cf   :  { %2203 = vrsqrt.f32 %v994_v53  ;;  %vm1011_vm2 = vweird.f32 %v994_v53 }
 0x9d5   :  { %v2204_v54 = vpop.eup %2203 }
 0x9d6   :  { %v1006_v56 = vmul.f32 %v2204_v54, %v994_v53  ;;  %vm1012_vm1 = vweird.f32 %v2204_v54 }
 0x9d7   :  { %vm1013_vm3 = vmor %vm1011_vm2, %vm1012_vm1  ;;  %vm1952_vm2 = vcmask 0  }
 0x9d8   :  { %v1007_v62 = vmul.f32 %v2204_v54, %v1006_v56 }
 0x9da   :  { %v1008_v1 = vmul.f32 0.5, %v1007_v62 }
 0x9dc   :  { %v1009_v2 = vsub.f32 1.5, %v1008_v1 }
 0x9de   :  { %v1010_v55 = vmul.f32 %v2204_v54, %v1009_v2 }
 0x9e0   :  { %v1014_v58 = vsel %vm1013_vm3, %v2204_v54, %v1010_v55 }
 0x9e1   :  { %v1016_v3 = vmul.f32 %v1014_v58, %v982_v32 }
 0x9e3   :  { %v1021_v4 = vmul.f32 %v2144_v44, %v1016_v3 }
 0x9e5   :  { %v2769_v5 = vadd.f32 %v2145_v40, %v1021_v4 }
 0x9e7   :  { %2026 = vmatmul.msk.f32.gmra.mxu2 %vm72_vm0, %v2769_v5 }
 0xa4f   :  { %v1060_v7 = vpop.f32.mrf.mxu2 }
 0xa50   :  { %v2776_v57 = vadd.f32 %v2146_v6, %v1060_v7 }
 0xa52   :  { %1068 = vrot.lane.b32.xlu2 %v2776_v57, %s2306_s2  ;;  %1072 = vrot.lane.b32.xlu1 %v2776_v57, %s2307_s24 }
 0xa6a   :  { %v1063_v60 = vpop.f32.mrf.mxu2 }
 0xa6b   :  { %v2782_v8 = vadd.f32 %v2146_v6, %v1063_v60 }
 0xa6d   :  { %1078 = vrot.lane.b32.xlu1 %v2782_v8, %s2308_s25  ;;  %1074 = vrot.lane.b32.xlu2 %v2782_v8, %s2307_s24  ;;  %s3116_s24 = smov 24  }
 0xa6e   :  { %1070 = vrot.lane.b32.xlu0 %v2782_v8, %s2306_s2  ;;  %s3115_s2 = smov 8  }
 0xa75   :  { %1106 = vrot.lane.b32.xlu2 %v2782_v8, %s2309_s3 }
 0xa76   :  { %1076 = vrot.lane.b32.xlu0 %v2776_v57, %s2308_s25  ;;  %s3117_s25 = smov 16  }
 0xa7e   :  { %1080 = vrot.lane.b32.xlu0 %v2776_v57, %s2309_s3 }
 0xaac   :  { %v2796_v9 = vpop.permute.xlu2 %1068 }
 0xaad   :  { %1132 = vrot.lane.b32.xlu1 %v2796_v9, %s2309_s3  ;;  %v2116_v56 = vpack.i.bf16 %v2796_v9, %v2776_v57 }
 0xac4   :  { %v2800_v13 = vpop.permute.xlu1 %1072 }
 0xac5   :  { %1184 = vrot.lane.b32.xlu2 %v2800_v13, %s2309_s3 }
 0xac7   :  { %v2804_v14 = vpop.permute.xlu2 %1074 }
 0xacf   :  { %v1107_v15 = vpop.permute.xlu2 %1106 }
 0xad0   :  { %2029 = vmatpush.xpose.msk.msrb.mxu0 %vm187_vm8, %v1107_v15 }
 0xad3   :  { %2030 = vmatmul.msk.f32.vlgmr.msrb.gmra.mxu0 %vm187_vm8, %v2782_v8 }
 0xadf   :  { %v2809_v16 = vpop.permute.xlu1 %1078 }
 0xae0   :  { %v2811_v61 = vpop.permute.xlu0 %1070  ;;  %1262 = vrot.lane.b32.xlu2 %v2809_v16, %s2309_s3 }
 0xae1   :  { %1158 = vrot.lane.b32.xlu0 %v2811_v61, %s2309_s3 }
 0xae8   :  { %v2817_v17 = vpop.permute.xlu0 %1076 }
 0xae9   :  { %1236 = vrot.lane.b32.xlu1 %v2817_v17, %s2309_s3  ;;  %1210 = vrot.lane.b32.xlu0 %v2804_v14, %s2309_s3 }
 0xaf0   :  { %v1081_v18 = vpop.permute.xlu0 %1080 }
 0xaf1   :  { %2027 = vmatpush.xpose.msk.msra.mxu3 %vm187_vm8, %v1081_v18 }
 0xaf4   :  { %2028 = vmatmul.msk.f32.vlgmr.msra.gmra.mxu3 %vm187_vm8, %v2776_v57 }
 0xb1f   :  { %v1133_v19 = vpop.permute.xlu1 %1132  ;;  %v1185_v20 = vpop.permute.xlu2 %1184 }
 0xb20   :  { %2031 = vmatpush.xpose.msk.msra.mxu2 %vm187_vm8, %v1133_v19  ;;  %2035 = vmatpush.xpose.msk.msra.mxu0 %vm187_vm8, %v1185_v20 }
 0xb23   :  { %2032 = vmatmul.msk.f32.vlgmr.msra.gmra.mxu2 %vm187_vm8, %v2796_v9  ;;  %2036 = vmatmul.msk.f32.vlgmr.msra.gmra.mxu0 %vm187_vm8, %v2800_v13 }
 0xb3a   :  { %v1263_v21 = vpop.permute.xlu2 %1262 }
 0xb3b   :  { %2041 = vmatpush.xpose.msk.msrb.mxu0 %vm187_vm8, %v1263_v21 }
 0xb3e   :  { %2042 = vmatmul.msk.f32.vlgmr.msrb.gmra.mxu0 %vm187_vm8, %v2809_v16 }
 0xb50   :  { %v1129_v22 = vpop.f32.mrf.mxu0 }
 0xb51   :  { %v1289_v23 = vsel %vm2534_vm9, %v1129_v22, -1e+30 }
 0xb52   :  { %v1299_v24 = vsel %vm187_vm8, %v1289_v23, -inf }
 0xb53   :  { %v1159_v25 = vpop.permute.xlu0 %1158  ;;  %1300 = vmax.xlane.f32.xlu2 %v1299_v24 }
 0xb54   :  { %2033 = vmatpush.xpose.msk.msrb.mxu3 %vm187_vm8, %v1159_v25 }
 0xb57   :  { %2034 = vmatmul.msk.f32.vlgmr.msrb.gmra.mxu3 %vm187_vm8, %v2811_v61 }
 0xb5b   :  { %v1237_v26 = vpop.permute.xlu1 %1236  ;;  %v1211_v27 = vpop.permute.xlu0 %1210 }
 0xb5c   :  { %2037 = vmatpush.xpose.msk.msrb.mxu2 %vm187_vm8, %v1211_v27  ;;  %2039 = vmatpush.xpose.msk.msra.mxu3 %vm187_vm8, %v1237_v26 }
 0xb5f   :  { %2038 = vmatmul.msk.f32.vlgmr.msrb.gmra.mxu2 %vm187_vm8, %v2804_v14  ;;  %2040 = vmatmul.msk.f32.vlgmr.msra.gmra.mxu3 %vm187_vm8, %v2817_v17 }
 0xb77   :  { %v1103_v28 = vpop.f32.mrf.mxu3 }
 0xb78   :  { %v1288_v29 = vsel %vm2534_vm9, %v1103_v28, -1e+30 }
 0xb79   :  { %v1296_v30 = vsel %vm187_vm8, %v1288_v29, -inf }
 0xb7a   :  { %1297 = vmax.xlane.f32.xlu1 %v1296_v30 }
 0xba0   :  { %v1207_v31 = vpop.f32.mrf.mxu0 }
 0xba1   :  { %v1292_v32 = vsel %vm2534_vm9, %v1207_v31, -1e+30 }
 0xba2   :  { %v1308_v33 = vsel %vm187_vm8, %v1292_v32, -inf }
 0xba3   :  { %1309 = vmax.xlane.f32.xlu1 %v1308_v33 }
 0xba6   :  { %v1155_v34 = vpop.f32.mrf.mxu2 }
 0xba7   :  { %v1290_v35 = vsel %vm2534_vm9, %v1155_v34, -1e+30 }
 0xba8   :  { %v1302_v36 = vsel %vm187_vm8, %v1290_v35, -inf }
 0xba9   :  { %1303 = vmax.xlane.f32.xlu0 %v1302_v36 }
 0xbbb   :  { %v1285_v37 = vpop.f32.mrf.mxu0 }
 0xbbc   :  { %v1295_v47 = vsel %vm2534_vm9, %v1285_v37, -1e+30 }
 0xbbd   :  { %v1317_v38 = vsel %vm187_vm8, %v1295_v47, -inf }
 0xbbe   :  { %1318 = vmax.xlane.f32.xlu0 %v1317_v38 }
 0xbc6   :  { %v1301_v59 = vpop.xlane.xlu2 %1300 }
 0xbc7   :  { %v1321_v52 = vsub.f32 %v1289_v23, %v1301_v59 }
 0xbc9   :  { %v1330_v63 = vmul.f32 1.442695, %v1321_v52  ;;  %v2121_v52 = vpack.i.bf16 %v2800_v13, %v2782_v8 }
 0xbcb   :  { %2205 = vpow2.f32 %v1330_v63 }
 0xbd1   :  { %v2862_v42 = vpop.eup %2205 }
 0xbd2   :  { %v1347_v46 = vsel %vm187_vm8, %v2862_v42, 0.0 }
 0xbda   :  { %v1181_v0 = vpop.f32.mrf.mxu3 }
 0xbdb   :  { %v1291_v39 = vsel %vm2534_vm9, %v1181_v0, -1e+30 }
 0xbdc   :  { %v1305_v41 = vsel %vm187_vm8, %v1291_v39, -inf }
 0xbdd   :  { %1306 = vmax.xlane.f32.xlu0 %v1305_v41 }
 0xbe2   :  { %v1233_v43 = vpop.f32.mrf.mxu2  ;;  %v1259_v54 = vpop.f32.mrf.mxu3 }
 0xbe3   :  { %v1293_v44 = vsel %vm2534_vm9, %v1233_v43, -1e+30  ;;  %v1294_v62 = vsel %vm2534_vm9, %v1259_v54, -1e+30 }
 0xbe4   :  { %v1311_v45 = vsel %vm187_vm8, %v1293_v44, -inf  ;;  %v1314_v1 = vsel %vm187_vm8, %v1294_v62, -inf }
 0xbe5   :  { %1312 = vmax.xlane.f32.xlu1 %v1311_v45  ;;  %1348 = vadd.xlane.f32.xlu0 %v1347_v46 }
 0xbed   :  { %v1298_v40 = vpop.xlane.xlu1 %1297 }
 0xbee   :  { %v1320_v48 = vsub.f32 %v1288_v29, %v1298_v40 }
 0xbf0   :  { %v1328_v49 = vmul.f32 1.442695, %v1320_v48 }
 0xbf2   :  { %2207 = vpow2.f32 %v1328_v49 }
 0xbf8   :  { %v2208_v51 = vpop.eup %2207 }
 0xbf9   :  { %v1344_v53 = vsel %vm187_vm8, %v2208_v51, 0.0 }
 0xbfa   :  { %1345 = vadd.xlane.f32.xlu2 %v1344_v53 }
 0xbfe   :  { %2117 = vrot.lane.b32.xlu1 %v2116_v56, %s3114_s22 }
 0xc02   :  { %1315 = vmax.xlane.f32.xlu2 %v1314_v1 }
 0xc16   :  { %v1310_v2 = vpop.xlane.xlu1 %1309 }
 0xc17   :  { %v1324_v55 = vsub.f32 %v1292_v32, %v1310_v2 }
 0xc19   :  { %v1336_v58 = vmul.f32 1.442695, %v1324_v55 }
 0xc1b   :  { %2209 = vpow2.f32 %v1336_v58 }
 0xc1c   :  { %v1304_v3 = vpop.xlane.xlu0 %1303 }
 0xc1d   :  { %v1322_v4 = vsub.f32 %v1290_v35, %v1304_v3 }
 0xc1f   :  { %v1332_v6 = vmul.f32 1.442695, %v1322_v4 }
 0xc21   :  { %v2876_v7 = vpop.eup %2209  ;;  %2211 = vpow2.f32 %v1332_v6 }
 0xc22   :  { %v1356_v57 = vsel %vm187_vm8, %v2876_v7, 0.0 }
 0xc23   :  { %1357 = vadd.xlane.f32.xlu2 %v1356_v57 }
 0xc27   :  { %v2212_v12 = vpop.eup %2211 }
 0xc28   :  { %v1350_v60 = vsel %vm187_vm8, %v2212_v12, 0.0 }
 0xc29   :  { %1351 = vadd.xlane.f32.xlu1 %v1350_v60 }
 0xc31   :  { %v1319_v9 = vpop.xlane.xlu0 %1318 }
 0xc32   :  { %v1327_v23 = vsub.f32 %v1295_v47, %v1319_v9  ;;  %v2126_v47 = vpack.i.bf16 %v2817_v17, %v2811_v61 }
 0xc34   :  { %v1342_v26 = vmul.f32 1.442695, %v1327_v23  ;;  %v2052_v23 = vld [vmem:[%s3077_s4 + $0x28] sm:$0xff] }
 0xc42   :  { %1514 = vrot.lane.b32.xlu1 %v2804_v14, %s3114_s22 }
 0xc4a   :  { %1566 = vrot.lane.b32.xlu1 %v2809_v16, %s3114_s22 }
 0xc50   :  { %v1307_v15 = vpop.xlane.xlu0 %1306 }
 0xc51   :  { %v1323_v18 = vsub.f32 %v1291_v39, %v1307_v15 }
 0xc53   :  { %v1334_v19 = vmul.f32 1.442695, %v1323_v18 }
 0xc55   :  { %2213 = vpow2.f32 %v1334_v19 }
 0xc58   :  { %v1313_v20 = vpop.xlane.xlu1 %1312  ;;  %v1349_v41 = vpop.xlane.xlu0 %1348 }
 0xc59   :  { %v1325_v21 = vsub.f32 %v1293_v44, %v1313_v20 }
 0xc5b   :  { %v2214_v22 = vpop.eup %2213  ;;  %v1338_v24 = vmul.f32 1.442695, %v1325_v21  ;;  %v2054_v21 = vld [vmem:[%s3077_s4 + $0x38] sm:$0xff] }
 0xc5c   :  { %v1353_v25 = vsel %vm187_vm8, %v2214_v22, 0.0 }
 0xc5d   :  { %2215 = vpow2.f32 %v1338_v24  ;;  %1354 = vadd.xlane.f32.xlu0 %v1353_v25  ;;  %v2051_v24 = vld [vmem:[%s3077_s4 + $0x20] sm:$0xff] }
 0xc5e   :  { %2217 = vpow2.f32 %v1342_v26 }
 0xc63   :  { %v2886_v27 = vpop.eup %2215 }
 0xc64   :  { %v1359_v14 = vsel %vm187_vm8, %v2886_v27, 0.0  ;;  %v2218_v16 = vpop.eup %2217 }
 0xc65   :  { %1360 = vadd.xlane.f32.xlu0 %v1359_v14  ;;  %v1365_v28 = vsel %vm187_vm8, %v2218_v16, 0.0 }
 0xc6d   :  { %1366 = vadd.xlane.f32.xlu0 %v1365_v28  ;;  %v1346_v29 = vpop.xlane.xlu2 %1345 }
 0xc6e   :  { %2219 = vrcp.f32 %v1346_v29 }
 0xc70   :  { %v2118_v30 = vpop.permute.xlu1 %2117 }
 0xc71   :  { %v2120_v31 = vunpack.i.h.bf16 %v2118_v30  ;;  %v2119_v32 = vunpack.i.l.bf16 %v2118_v30 }
 0xc73   :  { %1405 = vmatpush.msra.mxu2 %v2119_v32  ;;  %1457 = vmatpush.msra.mxu0 %v2120_v31 }
 0xc74   :  { %v2220_v33 = vpop.eup %2219 }
 0xc75   :  { %v1376_v34 = vmul.f32 %v2220_v33, %v2208_v51  ;;  %v1316_v35 = vpop.xlane.xlu2 %1315 }
 0xc76   :  { %v1326_v36 = vsub.f32 %v1294_v62, %v1316_v35  ;;  %v2147_v35 = vld [vmem:[%s3078_s5 + $0x1] ss:$0 sm:$0xff] }
 0xc77   :  { %2043 = vmatmul.msk.f32.vlgmr.msra.gmra.mxu2 %vm187_vm8, %v1376_v34 }
 0xc78   :  { %v1340_v37 = vmul.f32 1.442695, %v1326_v36 }
 0xc7a   :  { %2221 = vpow2.f32 %v1340_v37 }
 0xc80   :  { %v2222_v38 = vpop.eup %2221 }
 0xc81   :  { %2127 = vrot.lane.b32.xlu0 %v2126_v47, %s3114_s22  ;;  %v1362_v59 = vsel %vm187_vm8, %v2222_v38, 0.0 }
 0xc82   :  { %1363 = vadd.xlane.f32.xlu2 %v1362_v59 }
 0xc96   :  { %v1358_v44 = vpop.xlane.xlu2 %1357 }
 0xc9a   :  { %2122 = vrot.lane.b32.xlu2 %v2121_v52, %s3114_s22 }
 0xc9c   :  { %v1352_v63 = vpop.xlane.xlu1 %1351 }
 0xc9d   :  { %2223 = vrcp.f32 %v1352_v63 }
 0xca3   :  { %v2224_v0 = vpop.eup %2223 }
 0xca4   :  { %v1378_v39 = vmul.f32 %v2224_v0, %v2212_v12 }
 0xca6   :  { %2045 = vmatmul.msk.f32.vlgmr.msra.gmra.mxu0 %vm187_vm8, %v1378_v39 }
 0xcb4   :  { %v1515_v45 = vpop.permute.xlu1 %1514 }
 0xcbc   :  { %v1567_v51 = vpop.permute.xlu1 %1566 }
 0xcd0   :  { %v1355_v43 = vpop.xlane.xlu0 %1354 }
 0xcd1   :  { %2225 = vrcp.f32 %v1355_v43 }
 0xcd2   :  { %2227 = vrcp.f32 %v1349_v41 }
 0xcd7   :  { %v2226_v46 = vpop.eup %2225 }
 0xcd8   :  { %v1361_v61 = vpop.xlane.xlu0 %1360  ;;  %v1379_v48 = vmul.f32 %v2226_v46, %v2214_v22  ;;  %v2228_v53 = vpop.eup %2227  ;;  %v2053_v22 = vld [vmem:[%s3077_s4 + $0x30] sm:$0xff] }
 0xcd9   :  { %v1377_v4 = vmul.f32 %v2228_v53, %v2862_v42 }
 0xce0   :  { %v1367_v17 = vpop.xlane.xlu0 %1366 }
 0xce1   :  { %2229 = vrcp.f32 %v1367_v17 }
 0xce2   :  { %2231 = vrcp.f32 %v1358_v44 }
 0xce7   :  { %v2230_v54 = vpop.eup %2229 }
 0xce8   :  { %v2232_v56 = vpop.eup %2231  ;;  %v1383_v1 = vmul.f32 %v2230_v54, %v2218_v16  ;;  %v2082_v54 = vld [vmem:[%s3081_s8 + $0xf8] sm:$0xff] }
 0xce9   :  { %v1380_v6 = vmul.f32 %v2232_v56, %v2876_v7  ;;  %v2081_v56 = vld [vmem:[%s3081_s8 + $0xf0] sm:$0xff] }
 0xcf3   :  { %v2128_v40 = vpop.permute.xlu0 %2127 }
 0xcf4   :  { %v2130_v8 = vunpack.i.h.bf16 %v2128_v40  ;;  %v2129_v13 = vunpack.i.l.bf16 %v2128_v40  ;;  %v2063_v40 = vld [vmem:[%s3079_s6 + $0x38] sm:$0xff] }
 0xcf5   :  { %v1364_v49 = vpop.xlane.xlu2 %1363 }
 0xcf6   :  { %2233 = vrcp.f32 %v1364_v49  ;;  %1483 = vmatpush.msra.mxu1 %v2129_v13  ;;  %1561 = vmatpush.msrb.mxu0 %v2130_v8  ;;  %v2062_v8 = vld [vmem:[%s3079_s6 + $0x30] sm:$0xff]  ;;  %v2061_v13 = vld [vmem:[%s3079_s6 + $0x28] sm:$0xff] }
 0xcf7   :  { %2046 = vmatmul.msk.f32.vlgmr.msra.gmra.mxu1 %vm187_vm8, %v1379_v48  ;;  %2235 = vrcp.f32 %v1361_v61  ;;  %v2060_v48 = vld [vmem:[%s3079_s6 + $0x20] sm:$0xff] }
 0xcf8   :  { %1587 = vmatpush.msrb.mxu1 %v1567_v51  ;;  %1786 = vmatpush.msra.mxu0 %v2082_v54 }
 0xcfa   :  { %v1407_v7 = vpop.f32.mrf.mxu2  ;;  %1787 = vmatpush.msra.mxu0 %v2081_v56 }
 0xcfc   :  { %v2234_v62 = vpop.eup %2233 }
 0xcfd   :  { %v1382_v2 = vmul.f32 %v2234_v62, %v2222_v38  ;;  %v2123_v55 = vpop.permute.xlu2 %2122  ;;  %v2236_v57 = vpop.eup %2235  ;;  %v2080_v62 = vld [vmem:[%s3081_s8 + $0xe8] sm:$0xff] }
 0xcfe   :  { %v2125_v58 = vunpack.i.h.bf16 %v2123_v55  ;;  %v2124_v3 = vunpack.i.l.bf16 %v2123_v55  ;;  %v1381_v12 = vmul.f32 %v2236_v57, %v2886_v27  ;;  %v2079_v55 = vld [vmem:[%s3081_s8 + $0xe0] sm:$0xff]  ;;  %1788 = vmatpush.msra.mxu0 %v2080_v62  ;;  %v2077_v57 = vld [vmem:[%s3081_s8 + $0xd0] sm:$0xff] }
 0xcff   :  { %2049 = vmatmul.msk.f32.vlgmr.msrb.gmra.mxu0 %vm187_vm8, %v1382_v2  ;;  %2050 = vmatmul.msk.f32.vlgmr.msrb.gmra.mxu1 %vm187_vm8, %v1383_v1 }
 0xd00   :  { %1431 = vmatpush.msrb.mxu3 %v2124_v3  ;;  %1509 = vmatpush.msrb.mxu2 %v2125_v58 }
 0xd01   :  { %2044 = vmatmul.msk.f32.vlgmr.msrb.gmra.mxu3 %vm187_vm8, %v1377_v4  ;;  %2047 = vmatmul.msk.f32.vlgmr.msrb.gmra.mxu2 %vm187_vm8, %v1380_v6  ;;  %v2078_v4 = vld [vmem:[%s3081_s8 + $0xd8] sm:$0xff] }
 0xd02   :  { %1535 = vmatpush.msra.mxu3 %v1515_v45  ;;  %1645 = vmatpush.msra.mxu2 %v2054_v21  ;;  %v2148_v21 = vld [vmem:[%s3085_s12 + $0x1] ss:$0 sm:$0xff] }
 0xd03   :  { %1789 = vmatpush.msra.mxu0 %v2079_v55  ;;  %v1872_v55 = vld [vmem:[%s3089_s16 + $0x18] sm:$0xff] }
 0xd04   :  { %1646 = vmatpush.msra.mxu2 %v2053_v22  ;;  %1751 = vmatpush.msrb.mxu3 %v2063_v40  ;;  %v2073_v22 = vld [vmem:[%s3081_s8 + $0xb0] sm:$0xff] }
 0xd05   :  { %1790 = vmatpush.msra.mxu0 %v2078_v4  ;;  %1895 = vmatpush.msra.mxu1 %v1872_v55  ;;  %v1869_v4 = vld [vmem:[%s3089_s16] sm:$0xff] }
 0xd06   :  { %1647 = vmatpush.msra.mxu2 %v2052_v23  ;;  %1752 = vmatpush.msrb.mxu3 %v2062_v8 }
 0xd07   :  { %1791 = vmatpush.msra.mxu0 %v2077_v57 }
 0xd08   :  { %1648 = vmatpush.msra.mxu2 %v2051_v24  ;;  %1753 = vmatpush.msrb.mxu3 %v2061_v13 }
 0xd09   :  { %2048 = vmatmul.msk.f32.vlgmr.msra.gmra.mxu3 %vm187_vm8, %v1381_v12 }
 0xd0a   :  { %1754 = vmatpush.msrb.mxu3 %v2060_v48 }
 0xd23   :  { %v1459_v60 = vpop.f32.mrf.mxu0 }
 0xd24   :  { %1594 = vrot.lane.b32.xlu2 %v1459_v60, %s3115_s2  ;;  %v2076_v60 = vld [vmem:[%s3081_s8 + $0xc8] sm:$0xff] }
 0xd25   :  { %1792 = vmatpush.msra.mxu0 %v2076_v60 }
 0xd74   :  { %v1485_v42 = vpop.f32.mrf.mxu1 }
 0xd75   :  { %1596 = vrot.lane.b32.xlu0 %v1485_v42, %s3115_s2 }
 0xd7c   :  { %v1563_v9 = vpop.f32.mrf.mxu0  ;;  %v1589_v15 = vpop.f32.mrf.mxu1 }
 0xd7d   :  { %1610 = vrot.lane.b32.xlu2 %v1563_v9, %s3116_s24 }
 0xd7e   :  { %v1595_v25 = vpop.permute.xlu2 %1594 }
 0xd7f   :  { %v1616_v27 = vsel %vm187_vm8, %v1407_v7, %v1595_v25  ;;  %v2075_v7 = vld [vmem:[%s3081_s8 + $0xc0] sm:$0xff] }
 0xd80   :  { %1793 = vmatpush.msra.mxu0 %v2075_v7 }
 0xd84   :  { %v1433_v18 = vpop.f32.mrf.mxu3  ;;  %v1511_v19 = vpop.f32.mrf.mxu2 }
 0xd85   :  { %1612 = vrot.lane.b32.xlu2 %v1589_v15, %s3116_s24  ;;  %1602 = vrot.lane.b32.xlu1 %v1511_v19, %s3117_s25 }
 0xd8c   :  { %v1537_v20 = vpop.f32.mrf.mxu3 }
 0xd8d   :  { %1604 = vrot.lane.b32.xlu1 %v1537_v20, %s3117_s25  ;;  %s1974_s25 = sshll.u32 %s3092_s19, 4  ;;  %s1975_s25 = int_to_ptr.hbm [resolvable:$true] %s1974_s25 }
 0xdd7   :  { %v1611_v26 = vpop.permute.xlu2 %1610 }
 0xddf   :  { %v1613_v32 = vpop.permute.xlu2 %1612 }
 0xde7   :  { %v1597_v29 = vpop.permute.xlu0 %1596 }
 0xde8   :  { %v1617_v30 = vsel %vm187_vm8, %v1433_v18, %v1597_v29  ;;  %v2074_v18 = vld [vmem:[%s3081_s8 + $0xb8] sm:$0xff] }
 0xde9   :  { %1794 = vmatpush.msra.mxu0 %v2074_v18 }
 0xdeb   :  { %1795 = vmatpush.msra.mxu0 %v2073_v22 }
 0xdf7   :  { %v1603_v14 = vpop.permute.xlu1 %1602 }
 0xdf8   :  { %v1618_v16 = vsel %vm726_vm10, %v1616_v27, %v1603_v14  ;;  %v2072_v27 = vld [vmem:[%s3081_s8 + $0xa8] sm:$0xff] }
 0xdf9   :  { %v1620_v28 = vsel %vm729_vm11, %v1618_v16, %v1611_v26  ;;  %v2149_v26 = vld [vmem:[%s3086_s13 + $0x1] ss:$0 sm:$0xff]  ;;  %1796 = vmatpush.msra.mxu0 %v2072_v27 }
 0xdfa   :  { %2055 = vmatmul.msk.f32.vlgmr.msra.gmra.mxu2 %vm72_vm0, %v1620_v28  ;;  %v2071_v28 = vld [vmem:[%s3081_s8 + $0xa0] sm:$0xff] }
 0xdfb   :  { %1797 = vmatpush.msra.mxu0 %v2071_v28  ;;  %v2153_v27 = vld [vmem:[%s3088_s15 + $0x1] ss:$0 sm:$0xff] }
 0xdff   :  { %v1605_v31 = vpop.permute.xlu1 %1604 }
 0xe00   :  { %v1619_v33 = vsel %vm726_vm10, %v1617_v30, %v1605_v31  ;;  %v2070_v31 = vld [vmem:[%s3081_s8 + $0x98] sm:$0xff] }
 0xe01   :  { %v1621_v34 = vsel %vm729_vm11, %v1619_v33, %v1613_v32  ;;  %1798 = vmatpush.msra.mxu0 %v2070_v31 }
 0xe02   :  { %2056 = vmatmul.msk.f32.gmra.mxu2 %vm72_vm0, %v1621_v34 }
 0xe7d   :  { %v1650_v36 = vpop.f32.mrf.mxu2 }
 0xe7e   :  { %v1656_v37 = vadd.f32 %v1650_v36, %v2764_v50 }
 0xe80   :  { %v1663_v47 = vadd.f32 %v2147_v35, %v1656_v37  ;;  %v2069_v37 = vld [vmem:[%s3081_s8 + $0x90] sm:$0xff] }
 0xe81   :  { %1799 = vmatpush.msra.mxu0 %v2069_v37  ;;  %v2154_v37 = vld [vmem:[%s3090_s17] ss:$0 sm:$0xff] }
 0xe82   :  { %v1669_v38 = vsel %vm72_vm0, %v1663_v47, 0.0 }
 0xe83   :  { %1670 = vadd.xlane.f32.xlu0 %v1669_v38  ;;  %v2067_v38 = vld [vmem:[%s3081_s8 + $0x80] sm:$0xff] }
 0xe85   :  { %v1653_v59 = vpop.f32.mrf.mxu2 }
 0xe86   :  { %v1657_v52 = vadd.f32 %v1653_v59, %v2769_v5  ;;  %v2150_v59 = vld [vmem:[%s3080_s7 + $0x1] ss:$0 sm:$0xff] }
 0xe88   :  { %v1664_v63 = vadd.f32 %v2147_v35, %v1657_v52 }
 0xe8a   :  { %v1672_v0 = vsel %vm72_vm0, %v1664_v63, 0.0 }
 0xe8b   :  { %1673 = vadd.xlane.f32.xlu1 %v1672_v0 }
 0xef6   :  { %v1671_v39 = vpop.xlane.xlu0 %1670 }
 0xef7   :  { %v1675_v41 = vmul.f32 %v1671_v39, %v2426_v10 }
 0xef9   :  { %v1677_v43 = vsub.f32 %v1663_v47, %v1675_v41  ;;  %v2068_v47 = vld [vmem:[%s3081_s8 + $0x88] sm:$0xff] }
 0xefa   :  { %1800 = vmatpush.msra.mxu0 %v2068_v47 }
 0xefb   :  { %v1679_v61 = vmul.f32 %v1677_v43, %v1677_v43 }
 0xefc   :  { %1801 = vmatpush.msra.mxu0 %v2067_v38 }
 0xefd   :  { %v1681_v17 = vsel %vm72_vm0, %v1679_v61, 0.0  ;;  %v2151_v61 = vld [vmem:[%s3082_s9 + $0x1] ss:$0 sm:$0xff] }
 0xefe   :  { %1682 = vadd.xlane.f32.xlu2 %v1681_v17  ;;  %v1674_v50 = vpop.xlane.xlu1 %1673 }
 0xeff   :  { %v1676_v44 = vmul.f32 %v1674_v50, %v2426_v10 }
 0xf01   :  { %v2945_v45 = vsub.f32 %v1664_v63, %v1676_v44 }
 0xf03   :  { %v1680_v5 = vmul.f32 %v2945_v45, %v2945_v45 }
 0xf05   :  { %v1684_v46 = vsel %vm72_vm0, %v1680_v5, 0.0 }
 0xf06   :  { %1685 = vadd.xlane.f32.xlu0 %v1684_v46 }
 0xf71   :  { %v1683_v49 = vpop.xlane.xlu2 %1682 }
 0xf72   :  { %v1687_v51 = vmul.f32 %v1683_v49, %v2426_v10 }
 0xf74   :  { %v1689_v53 = vadd.f32 1e-05, %v1687_v51 }
 0xf76   :  { %2237 = vrsqrt.f32 %v1689_v53  ;;  %vm1697_vm9 = vweird.f32 %v1689_v53 }
 0xf79   :  { %v1686_v1 = vpop.xlane.xlu0 %1685 }
 0xf7a   :  { %v1688_v2 = vmul.f32 %v1686_v1, %v2426_v10 }
 0xf7c   :  { %v2238_v58 = vpop.eup %2237  ;;  %v1690_v3 = vadd.f32 1e-05, %v1688_v2 }
 0xf7d   :  { %v1692_v6 = vmul.f32 %v2238_v58, %v1689_v53  ;;  %vm1698_vm8 = vweird.f32 %v2238_v58 }
 0xf7e   :  { %2239 = vrsqrt.f32 %v1690_v3  ;;  %vm1699_vm10 = vmor %vm1697_vm9, %vm1698_vm8  ;;  %vm1707_vm4 = vweird.f32 %v1690_v3 }
 0xf7f   :  { %v1693_v12 = vmul.f32 %v2238_v58, %v1692_v6 }
 0xf81   :  { %v1694_v42 = vmul.f32 0.5, %v1693_v12 }
 0xf83   :  { %v1695_v9 = vsub.f32 1.5, %v1694_v42 }
 0xf84   :  { %v2240_v15 = vpop.eup %2239 }
 0xf85   :  { %v1696_v19 = vmul.f32 %v2238_v58, %v1695_v9  ;;  %v1702_v20 = vmul.f32 %v2240_v15, %v1690_v3  ;;  %vm1708_vm11 = vweird.f32 %v2240_v15  ;;  %v1870_v3 = vld [vmem:[%s3089_s16 + $0x8] sm:$0xff] }
 0xf86   :  { %vm1709_vm5 = vmor %vm1707_vm4, %vm1708_vm11 }
 0xf87   :  { %v1700_v23 = vsel %vm1699_vm10, %v2238_v58, %v1696_v19  ;;  %v1703_v24 = vmul.f32 %v2240_v15, %v1702_v20  ;;  %v1871_v58 = vld [vmem:[%s3089_s16 + $0x10] sm:$0xff] }
 0xf88   :  { %v1711_v25 = vmul.f32 %v1700_v23, %v1677_v43  ;;  %1896 = vmatpush.msra.mxu1 %v1871_v58 }
 0xf89   :  { %v1704_v14 = vmul.f32 0.5, %v1703_v24  ;;  %v2152_v24 = vld [vmem:[%s3087_s14 + $0x1] ss:$0 sm:$0xff] }
 0xf8a   :  { %v1716_v16 = vmul.f32 %v2148_v21, %v1711_v25  ;;  %1897 = vmatpush.msra.mxu1 %v1870_v3 }
 0xf8b   :  { %v1705_v29 = vsub.f32 1.5, %v1704_v14 }
 0xf8c   :  { %v1721_v30 = vadd.f32 %v2149_v26, %v1716_v16  ;;  %1898 = vmatpush.msra.mxu1 %v1869_v4 }
 0xf8d   :  { %v1706_v32 = vmul.f32 %v2240_v15, %v1705_v29 }
 0xf8e   :  { %2065 = vmatmul.msk.f32.vlgmr.msrb.gmra.mxu3 %vm72_vm0, %v1721_v30 }
 0xf8f   :  { %v1710_v33 = vsel %vm1709_vm5, %v2240_v15, %v1706_v32 }
 0xf90   :  { %v1712_v34 = vmul.f32 %v1710_v33, %v2945_v45 }
 0xf92   :  { %v1717_v35 = vmul.f32 %v2148_v21, %v1712_v34 }
 0xf94   :  { %v1722_v36 = vadd.f32 %v2149_v26, %v1717_v35  ;;  %v1926_v35 = vld [vmem:[%s3118_s26] sm:$0xff] }
 0xf96   :  { %2066 = vmatmul.msk.f32.gmra.mxu3 %vm72_vm0, %v1722_v36 }
0x1011   :  { %v1756_v52 = vpop.f32.mrf.mxu3 }
0x1012   :  { %v1757_v63 = vadd.f32 %v2150_v59, %v1756_v52 }
0x1014   :  { %v1762_v0 = vmax.f32 %v1757_v63, 0.0  ;;  %v1927_v63 = vld [vmem:[%s3118_s26 + $0x8] sm:$0xff] }
0x1016   :  { %1802 = vmatmul.f32.vlgmr.msra.gmra.mxu0 %v1762_v0 }
0x1019   :  { %v1759_v39 = vpop.f32.mrf.mxu3 }
0x101a   :  { %v1760_v41 = vadd.f32 %v2150_v59, %v1759_v39 }
0x101c   :  { %v1763_v43 = vmax.f32 %v1760_v41, 0.0 }
0x101e   :  { %1805 = vmatmul.f32.gmra.mxu0 %v1763_v43 }
0x1093   :  { %v1803_v17 = vpop.f32.mrf.mxu0 }
0x1094   :  { %v1804_v50 = vadd.f32 %v2151_v61, %v1803_v17 }
0x1096   :  { %v1809_v44 = vadd.f32 %v1804_v50, %v1721_v30 }
0x1098   :  { %v1815_v45 = vsel %vm72_vm0, %v1809_v44, 0.0 }
0x1099   :  { %1816 = vadd.xlane.f32.xlu1 %v1815_v45 }
0x109b   :  { %v1806_v5 = vpop.f32.mrf.mxu0 }
0x109c   :  { %v1807_v46 = vadd.f32 %v2151_v61, %v1806_v5 }
0x109e   :  { %v1810_v40 = vadd.f32 %v1807_v46, %v1722_v36  ;;  %v2314_v36 = vmov 0  }
0x109f   :  { %2131 = vset.pattern.permute.xlu1 %v2314_v36  ;;  %2132 = vset.pattern.permute.xlu2 %v2314_v36 }
0x10a0   :  { %v1818_v8 = vsel %vm72_vm0, %v1810_v40, 0.0  ;;  %2133 = vset.pattern.permute.xlu0 %v2314_v36 }
0x10a1   :  { %1819 = vadd.xlane.f32.xlu2 %v1818_v8 }
0x110c   :  { %v1817_v13 = vpop.xlane.xlu1 %1816 }
0x110d   :  { %v1821_v48 = vmul.f32 %v1817_v13, %v2426_v10 }
0x110f   :  { %v1823_v49 = vsub.f32 %v1809_v44, %v1821_v48 }
0x1111   :  { %v1825_v51 = vmul.f32 %v1823_v49, %v1823_v49 }
0x1113   :  { %v1827_v53 = vsel %vm72_vm0, %v1825_v51, 0.0 }
0x1114   :  { %v1820_v54 = vpop.xlane.xlu2 %1819  ;;  %1828 = vadd.xlane.f32.xlu0 %v1827_v53 }
0x1115   :  { %v1822_v56 = vmul.f32 %v1820_v54, %v2426_v10 }
0x1117   :  { %v1824_v62 = vsub.f32 %v1810_v40, %v1822_v56 }
0x1119   :  { %v1826_v1 = vmul.f32 %v1824_v62, %v1824_v62 }
0x111b   :  { %v1830_v2 = vsel %vm72_vm0, %v1826_v1, 0.0 }
0x111c   :  { %1831 = vadd.xlane.f32.xlu1 %v1830_v2 }
0x1135   :  { %1929 = vperm.xlu1 %2131, %v1926_v35  }
0x1187   :  { %v1829_v6 = vpop.xlane.xlu0 %1828 }
0x1188   :  { %v1833_v57 = vmul.f32 %v1829_v6, %v2426_v10 }
0x118a   :  { %v1835_v12 = vadd.f32 1e-05, %v1833_v57 }
0x118c   :  { %2241 = vrsqrt.f32 %v1835_v12  ;;  %vm1843_vm7 = vweird.f32 %v1835_v12 }
0x118f   :  { %v1832_v60 = vpop.xlane.xlu1 %1831 }
0x1190   :  { %v1834_v42 = vmul.f32 %v1832_v60, %v2426_v10 }
0x1192   :  { %v2242_v7 = vpop.eup %2241  ;;  %v1836_v9 = vadd.f32 1e-05, %v1834_v42 }
0x1193   :  { %v1838_v15 = vmul.f32 %v2242_v7, %v1835_v12  ;;  %vm1844_vm6 = vweird.f32 %v2242_v7 }
0x1194   :  { %2243 = vrsqrt.f32 %v1836_v9  ;;  %vm1845_vm12 = vmor %vm1843_vm7, %vm1844_vm6  ;;  %vm1853_vm14 = vweird.f32 %v1836_v9 }
0x1195   :  { %v1839_v18 = vmul.f32 %v2242_v7, %v1838_v15 }
0x1197   :  { %v1840_v19 = vmul.f32 0.5, %v1839_v18 }
0x1199   :  { %v1841_v20 = vsub.f32 1.5, %v1840_v19 }
0x119a   :  { %v2244_v21 = vpop.eup %2243 }
0x119b   :  { %v1842_v22 = vmul.f32 %v2242_v7, %v1841_v20  ;;  %v1848_v23 = vmul.f32 %v2244_v21, %v1836_v9  ;;  %vm1854_vm13 = vweird.f32 %v2244_v21 }
0x119c   :  { %vm1855_vm15 = vmor %vm1853_vm14, %vm1854_vm13 }
0x119d   :  { %v1846_v25 = vsel %vm1845_vm12, %v2242_v7, %v1842_v22  ;;  %v1849_v26 = vmul.f32 %v2244_v21, %v1848_v23 }
0x119e   :  { %v1857_v10 = vmul.f32 %v1846_v25, %v1823_v49 }
0x119f   :  { %v1850_v14 = vmul.f32 0.5, %v1849_v26 }
0x11a0   :  { %v1862_v16 = vmul.f32 %v2152_v24, %v1857_v10 }
0x11a1   :  { %v1851_v28 = vsub.f32 1.5, %v1850_v14 }
0x11a2   :  { %v1867_v29 = vadd.f32 %v2153_v27, %v1862_v16 }
0x11a3   :  { %v1852_v30 = vmul.f32 %v2244_v21, %v1851_v28 }
0x11a4   :  { %2086 = vmatmul.msk.f32.vlgmr.msra.gmra.mxu1 %vm72_vm0, %v1867_v29 }
0x11a5   :  { %v1856_v31 = vsel %vm1855_vm15, %v2244_v21, %v1852_v30 }
0x11a6   :  { %v1858_v32 = vmul.f32 %v1856_v31, %v1824_v62 }
0x11a7   :  { %v1930_v46 = vpop.permute.xlu1 %1929 }
0x11a8   :  { %v1863_v33 = vmul.f32 %v2152_v24, %v1858_v32  ;;  %vm1934_vm1 = vcmp.eq.s32.totalorder %v2531_v11, %v1930_v46 }
0x11aa   :  { %v1868_v34 = vadd.f32 %v2153_v27, %v1863_v33 }
0x11ac   :  { %2087 = vmatmul.msk.f32.gmra.mxu1 %vm72_vm0, %v1868_v34 }
0x1221   :  { %v1900_v47 = vpop.f32.mrf.mxu1 }
0x1222   :  { %v1901_v38 = vadd.f32 %v2154_v37, %v1900_v47 }
0x1224   :  { %1906 = vst [vmem:[#allocation2] sm:$0xff] %v1901_v38  ;;  %1908 = vmax.xlane.f32.xlu2 %v1901_v38 }
0x1229   :  { %v1903_v59 = vpop.f32.mrf.mxu1 }
0x122a   :  { %v1904_v52 = vadd.f32 %v2154_v37, %v1903_v59 }
0x122c   :  { %1907 = vst [vmem:[#allocation2 + $0x8] sm:$0xff] %v1904_v52  ;;  %1910 = vmax.xlane.f32.xlu0 %v1904_v52 }
0x122d   :  { %1966 = dma.vmem_to_hbm [thread:$0]  %s1959_s10, 256, %s1961_s23, [#allocation3], %s2316_s11, %s2316_s11, %s3115_s2  }
0x122e   :  { %s1972_s2 = sshll.u32 %s2317_s18, 4  ;;  %s1973_s2 = int_to_ptr.vmem [resolvable:$true] %s1972_s2 }
0x123c   :  { %1932 = vperm.xlu2 %2132, %v1927_v63  }
0x1297   :  { %v1909_v0 = vpop.xlane.xlu2 %1908 }
0x1298   :  { %v1912_v39 = vsub.f32 %v1901_v38, %v1909_v0 }
0x129a   :  { %v1914_v41 = vmul.f32 1.442695, %v1912_v39  ;;  %v1936_v40 = vsel %vm1934_vm1, %v1912_v39, 0.0 }
0x129c   :  { %2245 = vpow2.f32 %v1914_v41 }
0x129f   :  { %v1911_v43 = vpop.xlane.xlu0 %1910  ;;  %v1933_v61 = vpop.permute.xlu2 %1932 }
0x12a0   :  { %v1913_v17 = vsub.f32 %v1904_v52, %v1911_v43  ;;  %vm1935_vm0 = vcmp.eq.s32.totalorder %v2531_v11, %v1933_v61 }
0x12a2   :  { %v2246_v50 = vpop.eup %2245  ;;  %v1916_v44 = vmul.f32 1.442695, %v1913_v17  ;;  %v1937_v45 = vsel %vm1935_vm0, %v1913_v17, 0.0 }
0x12a3   :  { %1918 = vadd.xlane.f32.xlu0 %v2246_v50  ;;  %1940 = vadd.xlane.f32.xlu2 %v1937_v45 }
0x12a4   :  { %2247 = vpow2.f32 %v1916_v44 }
0x12aa   :  { %v2248_v5 = vpop.eup %2247 }
0x12ab   :  { %1920 = vadd.xlane.f32.xlu0 %v2248_v5 }
0x12b3   :  { %1938 = vadd.xlane.f32.xlu0 %v1936_v40 }
0x1316   :  { %v1919_v8 = vpop.xlane.xlu0 %1918  ;;  %v1941_v54 = vpop.xlane.xlu2 %1940 }
0x1317   :  { %2249 = vlog2.f32 %v1919_v8 }
0x131d   :  { %v2250_v48 = vpop.eup %2249 }
0x131e   :  { %v1921_v13 = vpop.xlane.xlu0 %1920  ;;  %v1923_v11 = vmul.f32 0.6931472, %v2250_v48 }
0x131f   :  { %2251 = vlog2.f32 %v1921_v13 }
0x1325   :  { %v2252_v49 = vpop.eup %2251 }
0x1326   :  { %v1925_v51 = vmul.f32 0.6931472, %v2252_v49  ;;  %v1939_v53 = vpop.xlane.xlu0 %1938 }
0x1327   :  { %v1942_v56 = vsub.f32 %v1923_v11, %v1939_v53 }
0x1328   :  { %v1943_v62 = vsub.f32 %v1925_v51, %v1941_v54 }
0x132a   :  { %v1944_v1 = vadd.f32 %v1943_v62, %v1942_v56 }
0x132c   :  { %v1945_v2 = vrot.slane %v1944_v1, 4 }
0x132e   :  { %v1946_v55 = vadd.f32 %v1945_v2, %v1944_v1 }
0x1330   :  { %v1947_v58 = vrot.slane %v1946_v55, 2 }
0x1332   :  { %v1948_v3 = vadd.f32 %v1947_v58, %v1946_v55 }
0x1334   :  { %v1949_v4 = vrot.slane %v1948_v3, 1 }
0x1336   :  { %v1950_v6 = vadd.f32 %v1949_v4, %v1948_v3 }
0x1338   :  { %v1951_v57 = vmul.f32 0.0625, %v1950_v6 }
0x133a   :  { %1953 = vst.msk [vmem:[#allocation4] sm:$0x1] %vm1952_vm2, %v1951_v57 }
0x133b   :  { %1977 = dma.vmem_to_hbm [thread:$0]  %s1973_s2, 16, %s1975_s25, [#allocation5]  }
0x133c   :  { %2301 = dma.done.wait [#allocation3], 256  }
0x133d   :  { %2302 = vsyncadd [#allocation3], 4294967040 }
0x133e   :  { %2303 = dma.done.wait [#allocation5], 16  }
0x133f   :  { %2304 = vsyncadd [#allocation5], 4294967280 }
0x1340   :  { %1986 = vsyncpa [#allocation3], 1 }
0x1341   :  { %1987 = vsyncpa [#allocation5], 1 }

</bundles_post_ra>
